<compile_context>
chip_gen: v7x
topology: tpu7x:2x2x1
jax: 0.10.0
libtpu: 0.0.40
codegen_flags: <defaults>
</compile_context>

<pallas_src>
import functools

import jax
import jax.numpy as jnp
from jax.experimental import pallas as pl
from jax.experimental.pallas import tpu as pltpu

EPS = 1e-5
LANE = 128
SUBLANE = 8


# ----------------------------------------------------------------------------
# Small helpers
# ----------------------------------------------------------------------------
def _round_up(x, m):
    return (x + m - 1) // m * m


def _pad_ch(c):
    # Lane-dense only when already a multiple of 128; otherwise pad to a
    # sublane multiple.  Masked (sub-128-lane) stores are cheaper than the
    # 2-16x extra HBM traffic that padding to 128 would cost here.
    if c % LANE == 0:
        return c
    return _round_up(c, SUBLANE)


def _vmem_limit_bytes():
    # ~48 MiB on v7x (64 MiB physical VMEM/TC), ~100 MiB on v5e/v6e (128 MiB).
    try:
        cap = int(pltpu.get_tpu_info().vmem_capacity_bytes)
    except Exception:
        cap = 64 << 20
    return max(32 << 20, min(cap - (16 << 20), 100 << 20))


def _row_budget(c, cp, vmem_limit):
    # Rough per-output-row VMEM cost: bf16 im2col patch (18c), f32 acc +
    # bf16 z (12cp), double-buffered bf16 body (8c).
    per_row = 18 * c + 12 * cp + 8 * c
    return max(256, min(8192, (vmem_limit // 3) // per_row))


def _pick_row_tile(h, w, n, budget_rows):
    """Largest divisor th of h with (th*w) layout-friendly, under the VMEM
    row budget, preferring >=4 total grid steps (keeps both v7x TCs busy)."""
    divs = [d for d in range(1, h + 1) if h % d == 0]
    valid = [d for d in divs
             if (d == h or (d * w) % SUBLANE == 0) and d * w <= budget_rows]
    if not valid:
        valid = [d for d in divs if d == h or (d * w) % SUBLANE == 0]
        return min(valid)
    pref = [d for d in valid if n * (h // d) >= 4]
    return max(pref) if pref else max(valid)


def _pick_flat_tile(total, n, budget=8192):
    divs = [d for d in range(1, total + 1)
            if total % d == 0 and (d == total or d % SUBLANE == 0)
            and d <= budget]
    if not divs:
        return total
    pref = [d for d in divs if n * (total // d) >= 4]
    return max(pref) if pref else max(divs)


def _make_halo(body, th):
    """Rows directly above / below each row-tile: (N, n_th, 2, W, C).
    Boundary positions are filled with zeros (masked in-kernel when a BN
    prologue is fused)."""
    n, h, w, c = body.shape
    n_th = h // th
    zrow = jnp.zeros((n, 1, w, c), body.dtype)
    if n_th > 1:
        above = jnp.concatenate([zrow, body[:, th - 1::th][:, :n_th - 1]],
                                axis=1)
        below = jnp.concatenate([body[:, th::th][:, :n_th - 1], zrow], axis=1)
    else:
        above = zrow
        below = zrow
    return jnp.stack([above, below], axis=2)


def _prep_weight(w_oihw, cin_p, cp):
    """(Cout, Cin, 3, 3) -> (9*cin_p, cp) bf16 with (kh, kw, ci) row order."""
    cout, cin = w_oihw.shape[0], w_oihw.shape[1]
    wt = jnp.transpose(w_oihw, (2, 3, 1, 0)).astype(jnp.float32)  # (3,3,ci,co)
    wt = jnp.pad(wt, ((0, 0), (0, 0), (0, cin_p - cin), (0, cp - cout)))
    return wt.reshape(9 * cin_p, cp).astype(jnp.bfloat16)


# ----------------------------------------------------------------------------
# Kernel 1: 3x3 conv (single fat-K MXU dot per tile) + per-tile BN partial
# statistics.  Optional fused prologue: previous layer's BN scale/shift+ReLU.
# ----------------------------------------------------------------------------
def _conv_kernel(fuse, *refs):
    if fuse:
        (body_ref, halo_ref, w_ref, scale_ref, shift_ref,
         z_ref, s_ref, ss_ref) = refs
    else:
        body_ref, halo_ref, w_ref, z_ref, s_ref, ss_ref = refs
        scale_ref = shift_ref = None

    th = body_ref.shape[1]
    w_out = body_ref.shape[2]
    c = body_ref.shape[3]

    body = body_ref[0]                         # (th, W, C)  bf16
    halo = halo_ref[0, 0]                      # (2,  W, C)  bf16
    top, bot = halo[0:1], halo[1:2]

    if fuse:
        # Previous layer's BatchNorm affine + ReLU, applied to the loaded
        # pre-BN activation window (y1 never round-trips HBM).
        sc = scale_ref[...]                    # (1, C) f32, resident
        sh = shift_ref[...]
        body = jnp.maximum(body.astype(jnp.float32) * sc + sh,
                           0.0).astype(jnp.bfloat16)
        top = jnp.maximum(top.astype(jnp.float32) * sc + sh,
                          0.0).astype(jnp.bfloat16)
        bot = jnp.maximum(bot.astype(jnp.float32) * sc + sh,
                          0.0).astype(jnp.bfloat16)
        # Halo rows that are conv zero-padding (above the first row-tile,
        # below the last) must be zero *after* the affine+ReLU.
        i = pl.program_id(1)
        top = top * (i > 0).astype(jnp.bfloat16)
        bot = bot * (i < pl.num_programs(1) - 1).astype(jnp.bfloat16)

    # Assemble the (th+2, W+2, C) window in VMEM: halo rows + zero columns.
    win = jnp.concatenate([top, body, bot], axis=0)          # (th+2, W, C)
    zcol = jnp.zeros((th + 2, 1, c), win.dtype)
    win = jnp.concatenate([zcol, win, zcol], axis=1)         # (th+2, W+2, C)

    # In-VMEM im2col -> one fat MXU dot with K = 9*C (no thin-K dots, no
    # repeated f32 accumulator read-modify-write).
    cols = []
    for kh in range(3):
        xk = win[kh:kh + th]                                  # (th, W+2, C)
        for kw in range(3):
            cols.append(xk[:, kw:kw + w_out])                 # (th, W, C)
    patch = jnp.concatenate(cols, axis=-1).reshape(th * w_out, 9 * c)

    acc = jnp.dot(patch, w_ref[...], preferred_element_type=jnp.float32)

    z_ref[0] = acc.astype(z_ref.dtype)                        # bf16 pre-BN out
    s_ref[0, 0] = jnp.sum(acc, axis=0, keepdims=True)         # f32 stats
    ss_ref[0, 0] = jnp.sum(acc * acc, axis=0, keepdims=True)


def _conv_pallas(body, halo, wmat, scale, shift, *, th, vmem_limit):
    n, h, w, c = body.shape
    n_th = h // th
    k9, cp = wmat.shape
    rows = th * w
    fuse = scale is not None

    in_specs = [
        pl.BlockSpec((1, th, w, c), lambda b, i: (b, i, 0, 0)),
        pl.BlockSpec((1, 1, 2, w, c), lambda b, i: (b, i, 0, 0, 0)),
        pl.BlockSpec((k9, cp), lambda b, i: (0, 0)),           # resident
    ]
    args = [body, halo, wmat]
    if fuse:
        in_specs += [pl.BlockSpec((1, c), lambda b, i: (0, 0)),
                     pl.BlockSpec((1, c), lambda b, i: (0, 0))]
        args += [scale, shift]

    flops = 2 * n * h * w * k9 * cp
    bytes_accessed = (body.size * 2 + halo.size * 2 + wmat.size * 2
                      + n * h * w * cp * 2 + 2 * n * n_th * cp * 4)

    return pl.pallas_call(
        functools.partial(_conv_kernel, fuse),
        grid_spec=pltpu.PrefetchScalarGridSpec(
            num_scalar_prefetch=0,
            grid=(n, n_th),
            in_specs=in_specs,
            out_specs=[
                pl.BlockSpec((1, rows, cp), lambda b, i: (b, i, 0)),
                pl.BlockSpec((1, 1, 1, cp), lambda b, i: (b, i, 0, 0)),
                pl.BlockSpec((1, 1, 1, cp), lambda b, i: (b, i, 0, 0)),
            ],
        ),
        out_shape=(
            jax.ShapeDtypeStruct((n, h * w, cp), jnp.bfloat16),
            jax.ShapeDtypeStruct((n, n_th, 1, cp), jnp.float32),
            jax.ShapeDtypeStruct((n, n_th, 1, cp), jnp.float32),
        ),
        compiler_params=pltpu.CompilerParams(
            dimension_semantics=("parallel", "parallel"),
            vmem_limit_bytes=vmem_limit),
        cost_estimate=pl.CostEstimate(
            flops=flops, transcendentals=0, bytes_accessed=bytes_accessed),
    )(*args)


# ----------------------------------------------------------------------------
# Kernel 2: final BatchNorm apply (y = z*scale + shift) + ReLU.
# ----------------------------------------------------------------------------
def _bn_relu_kernel(z_ref, scale_ref, shift_ref, o_ref):
    z = z_ref[...].astype(jnp.float32)               # (1, TILE, Cp)
    y = z * scale_ref[...] + shift_ref[...]          # scale/shift: (1, Cp)
    o_ref[...] = jnp.maximum(y, 0.0).astype(o_ref.dtype)


def _bn_relu_pallas(z, scale, shift, out_dtype, vmem_limit):
    n, hw, cp = z.shape
    tile = _pick_flat_tile(hw, n)
    return pl.pallas_call(
        _bn_relu_kernel,
        grid_spec=pltpu.PrefetchScalarGridSpec(
            num_scalar_prefetch=0,
            grid=(n, hw // tile),
            in_specs=[
                pl.BlockSpec((1, tile, cp), lambda b, i: (b, i, 0)),
                pl.BlockSpec((1, cp), lambda b, i: (0, 0)),
                pl.BlockSpec((1, cp), lambda b, i: (0, 0)),
            ],
            out_specs=pl.BlockSpec((1, tile, cp), lambda b, i: (b, i, 0)),
        ),
        out_shape=jax.ShapeDtypeStruct((n, hw, cp), out_dtype),
        compiler_params=pltpu.CompilerParams(
            dimension_semantics=("parallel", "parallel"),
            vmem_limit_bytes=vmem_limit),
    )(z, scale, shift)


# ----------------------------------------------------------------------------
# One conv3x3 layer: pre-BN output z (bf16) + training-mode BN scale/shift.
# ----------------------------------------------------------------------------
def _conv_bn_layer(body, wmat, gamma, beta, *, scale_in=None, shift_in=None,
                   vmem_limit):
    n, h, w, c = body.shape
    k9, cp = wmat.shape
    th = _pick_row_tile(h, w, n, _row_budget(c, cp, vmem_limit))
    halo = _make_halo(body, th)
    z, s, ss = _conv_pallas(body, halo, wmat, scale_in, shift_in,
                            th=th, vmem_limit=vmem_limit)

    # Training-mode BatchNorm statistics over (N, H, W), biased variance.
    # NOTE: E[x^2]-E[x]^2 in f32; slightly less stable than two-pass but the
    # sums come straight from the f32 MXU accumulator.
    m = float(n * h * w)
    mean = jnp.sum(s, axis=(0, 1, 2)) / m                          # (Cp,)
    var = jnp.maximum(jnp.sum(ss, axis=(0, 1, 2)) / m - mean * mean, 0.0)
    cout = gamma.shape[0]
    gp = jnp.pad(gamma.astype(jnp.float32), (0, cp - cout))
    bp = jnp.pad(beta.astype(jnp.float32), (0, cp - cout))
    scale = gp * jax.lax.rsqrt(var + EPS)     # padded channels: scale=shift=0
    shift = bp - mean * scale
    return z, scale.reshape(1, cp), shift.reshape(1, cp)


def inconv_forward(x_nchw, params):
    """InConv / X2Conv forward, NCHW in / NCHW out (PyTorch convention).

    The conv biases (params['b1'], 'b2') are intentionally unused: training-
    mode BatchNorm subtracts the per-channel batch mean, which cancels a
    constant per-channel bias exactly."""
    n, cin, h, w = x_nchw.shape
    vmem_limit = _vmem_limit_bytes()

    cin_p = _pad_ch(cin)
    c1 = params["w1"].shape[0]
    c2 = params["w2"].shape[0]
    cp1 = _pad_ch(c1)
    cp2 = _pad_ch(c2)

    # NHWC, channel-padded, bf16 (MXU inputs; accumulation stays f32).
    x = jnp.transpose(x_nchw, (0, 2, 3, 1)).astype(jnp.float32)
    x = jnp.pad(x, ((0, 0), (0, 0), (0, 0), (0, cin_p - cin)))
    x = x.astype(jnp.bfloat16)

    w1 = _prep_weight(params["w1"], cin_p, cp1)
    w2 = _prep_weight(params["w2"], cp1, cp2)

    # Layer 1: conv3x3 -> bf16 pre-BN z1 + BN1 scale/shift (from f32 stats).
    z1, sc1, sh1 = _conv_bn_layer(x, w1, params["g1"], params["beta1"],
                                  vmem_limit=vmem_limit)
    z1 = z1.reshape(n, h, w, cp1)              # contiguous -> free reshape

    # Layer 2: BN1+ReLU fused as a prologue into the conv (y1 never hits HBM).
    z2, sc2, sh2 = _conv_bn_layer(z1, w2, params["g2"], params["beta2"],
                                  scale_in=sc1, shift_in=sh1,
                                  vmem_limit=vmem_limit)

    # Final BN2 + ReLU epilogue.
    y = _bn_relu_pallas(z2, sc2, sh2, jnp.float32, vmem_limit)
    y = y.reshape(n, h, w, cp2)[..., :c2]      # drop channel padding
    return jnp.transpose(y, (0, 3, 1, 2))      # back to NCHW


# ----------------------------------------------------------------------------
# Pure-JAX reference (exact module semantics, incl. conv bias).
# mxu_dtype=jnp.bfloat16 mirrors the kernel's bf16 MXU inputs / f32 accumulate.
# ----------------------------------------------------------------------------
def _ref_forward(x_nchw, params, mxu_dtype=jnp.float32):
    def conv(x, wgt, b):
        y = jax.lax.conv_general_dilated(
            x.astype(mxu_dtype), wgt.astype(mxu_dtype), (1, 1), "SAME",
            dimension_numbers=("NCHW", "OIHW", "NCHW"),
            preferred_element_type=jnp.float32)
        return y + b[None, :, None, None]

    def bn_relu(y, g, be):
        mean = jnp.mean(y, axis=(0, 2, 3), keepdims=True)
        var = jnp.mean((y - mean) ** 2, axis=(0, 2, 3), keepdims=True)
        z = (y - mean) * jax.lax.rsqrt(var + EPS)
        z = z * g[None, :, None, None] + be[None, :, None, None]
        return jnp.maximum(z, 0.0)

    y = bn_relu(conv(x_nchw, params["w1"], params["b1"]),
                params["g1"], params["beta1"])
    y = bn_relu(conv(y, params["w2"], params["b2"]),
                params["g2"], params["beta2"])
    return y


# ----------------------------------------------------------------------------
if __name__ == "__main__":
    key = jax.random.PRNGKey(0)
    N, in_ch, out_ch, H, W = 2, 4, 8, 16, 16

    ks = jax.random.split(key, 9)
    params = {
        "w1": 0.1 * jax.random.normal(ks[0], (out_ch, in_ch, 3, 3), jnp.float32),
        "b1": 0.1 * jax.random.normal(ks[1], (out_ch,), jnp.float32),
        "g1": 1.0 + 0.1 * jax.random.normal(ks[2], (out_ch,), jnp.float32),
        "beta1": 0.1 * jax.random.normal(ks[3], (out_ch,), jnp.float32),
        "w2": 0.1 * jax.random.normal(ks[4], (out_ch, out_ch, 3, 3), jnp.float32),
        "b2": 0.1 * jax.random.normal(ks[5], (out_ch,), jnp.float32),
        "g2": 1.0 + 0.1 * jax.random.normal(ks[6], (out_ch,), jnp.float32),
        "beta2": 0.1 * jax.random.normal(ks[7], (out_ch,), jnp.float32),
    }
    x = jax.random.normal(ks[8], (N, in_ch, H, W), jnp.float32)

    out = jax.block_until_ready(jax.jit(inconv_forward)(x, params))
    assert out.shape == (N, out_ch, H, W), out.shape

    # Precision-matched reference (bf16 MXU inputs, f32 accumulation).
    ref_bf16 = _ref_forward(x, params, mxu_dtype=jnp.bfloat16)
    err_m = float(jnp.max(jnp.abs(out - ref_bf16)))
    assert jnp.allclose(out, ref_bf16, atol=5e-2, rtol=5e-2), err_m

    # Full-f32 reference (exact module semantics): looser, covers bf16 rounding.
    ref_f32 = _ref_forward(x, params, mxu_dtype=jnp.float32)
    err_f = float(jnp.max(jnp.abs(out - ref_f32)))
    assert jnp.allclose(out, ref_f32, atol=1e-1, rtol=1e-1), err_f

    print("KERNEL_OK")
</pallas_src>

<mosaic_0001>
module attributes {stable_mosaic.version = 11 : i64} {
  func.func @_conv_kernel(%arg0: i32, %arg1: i32, %arg2: memref<1x8x16x8xbf16, #tpu.memory_space<vmem>>, %arg3: memref<1x1x2x16x8xbf16, #tpu.memory_space<vmem>>, %arg4: memref<72x8xbf16, #tpu.memory_space<vmem>>, %arg5: memref<1x128x8xbf16, #tpu.memory_space<vmem>>, %arg6: memref<1x1x1x8xf32, #tpu.memory_space<vmem>>, %arg7: memref<1x1x1x8xf32, #tpu.memory_space<vmem>>) attributes {dimension_semantics = [#tpu.dimension_semantics<parallel>, #tpu.dimension_semantics<parallel>], iteration_bounds = array<i64: 2, 2>, scalar_prefetch = 0 : i64, scratch_operands = 0 : i64, tpu.core_type = #tpu.core_type<tc>, window_params = [{transform_indices = @transform_0, window_bounds = array<i64: 1, 8, 16, 8>}, {transform_indices = @transform_1, window_bounds = array<i64: 1, 1, 2, 16, 8>}, {pipeline_mode = #tpu.pipeline_mode<synchronous>, transform_indices = @transform_2, window_bounds = array<i64: 72, 8>}, {transform_indices = @transform_3, window_bounds = array<i64: 1, 128, 8>}, {transform_indices = @transform_4, window_bounds = array<i64: 1, 1, 1, 8>}, {transform_indices = @transform_5, window_bounds = array<i64: 1, 1, 1, 8>}]} {
    %c0 = arith.constant 0 : index
    %c0_0 = arith.constant 0 : index
    %c0_1 = arith.constant 0 : index
    %c0_2 = arith.constant 0 : index
    %0 = vector.load %arg2[%c0, %c0_0, %c0_1, %c0_2] : memref<1x8x16x8xbf16, #tpu.memory_space<vmem>>, vector<1x8x16x8xbf16>
    %1 = vector.shape_cast %0 : vector<1x8x16x8xbf16> to vector<8x16x8xbf16>
    %c0_3 = arith.constant 0 : index
    %c0_4 = arith.constant 0 : index
    %c0_5 = arith.constant 0 : index
    %c0_6 = arith.constant 0 : index
    %c0_7 = arith.constant 0 : index
    %2 = vector.load %arg3[%c0_3, %c0_4, %c0_5, %c0_6, %c0_7] : memref<1x1x2x16x8xbf16, #tpu.memory_space<vmem>>, vector<1x1x2x16x8xbf16>
    %3 = vector.shape_cast %2 : vector<1x1x2x16x8xbf16> to vector<2x16x8xbf16>
    %4 = vector.extract_strided_slice %3 {offsets = [0, 0, 0], sizes = [1, 16, 8], strides = [1, 1, 1]} : vector<2x16x8xbf16> to vector<1x16x8xbf16>
    %5 = vector.extract_strided_slice %3 {offsets = [1, 0, 0], sizes = [1, 16, 8], strides = [1, 1, 1]} : vector<2x16x8xbf16> to vector<1x16x8xbf16>
    %6 = tpu.concatenate %4, %1, %5 in 0 : vector<1x16x8xbf16>, vector<8x16x8xbf16>, vector<1x16x8xbf16> -> vector<10x16x8xbf16>
    %cst = arith.constant 0.000000e+00 : bf16
    %7 = vector.broadcast %cst : bf16 to vector<10x1x8xbf16>
    %8 = tpu.concatenate %7, %6, %7 in 1 : vector<10x1x8xbf16>, vector<10x16x8xbf16>, vector<10x1x8xbf16> -> vector<10x18x8xbf16>
    %9 = vector.extract_strided_slice %8 {offsets = [0, 0, 0], sizes = [8, 18, 8], strides = [1, 1, 1]} : vector<10x18x8xbf16> to vector<8x18x8xbf16>
    %10 = vector.extract_strided_slice %9 {offsets = [0, 0, 0], sizes = [8, 16, 8], strides = [1, 1, 1]} : vector<8x18x8xbf16> to vector<8x16x8xbf16>
    %11 = vector.extract_strided_slice %9 {offsets = [0, 1, 0], sizes = [8, 16, 8], strides = [1, 1, 1]} : vector<8x18x8xbf16> to vector<8x16x8xbf16>
    %12 = vector.extract_strided_slice %9 {offsets = [0, 2, 0], sizes = [8, 16, 8], strides = [1, 1, 1]} : vector<8x18x8xbf16> to vector<8x16x8xbf16>
    %13 = vector.extract_strided_slice %8 {offsets = [1, 0, 0], sizes = [8, 18, 8], strides = [1, 1, 1]} : vector<10x18x8xbf16> to vector<8x18x8xbf16>
    %14 = vector.extract_strided_slice %13 {offsets = [0, 0, 0], sizes = [8, 16, 8], strides = [1, 1, 1]} : vector<8x18x8xbf16> to vector<8x16x8xbf16>
    %15 = vector.extract_strided_slice %13 {offsets = [0, 1, 0], sizes = [8, 16, 8], strides = [1, 1, 1]} : vector<8x18x8xbf16> to vector<8x16x8xbf16>
    %16 = vector.extract_strided_slice %13 {offsets = [0, 2, 0], sizes = [8, 16, 8], strides = [1, 1, 1]} : vector<8x18x8xbf16> to vector<8x16x8xbf16>
    %17 = vector.extract_strided_slice %8 {offsets = [2, 0, 0], sizes = [8, 18, 8], strides = [1, 1, 1]} : vector<10x18x8xbf16> to vector<8x18x8xbf16>
    %18 = vector.extract_strided_slice %17 {offsets = [0, 0, 0], sizes = [8, 16, 8], strides = [1, 1, 1]} : vector<8x18x8xbf16> to vector<8x16x8xbf16>
    %19 = vector.extract_strided_slice %17 {offsets = [0, 1, 0], sizes = [8, 16, 8], strides = [1, 1, 1]} : vector<8x18x8xbf16> to vector<8x16x8xbf16>
    %20 = vector.extract_strided_slice %17 {offsets = [0, 2, 0], sizes = [8, 16, 8], strides = [1, 1, 1]} : vector<8x18x8xbf16> to vector<8x16x8xbf16>
    %21 = tpu.concatenate %10, %11, %12, %14, %15, %16, %18, %19, %20 in 2 : vector<8x16x8xbf16>, vector<8x16x8xbf16>, vector<8x16x8xbf16>, vector<8x16x8xbf16>, vector<8x16x8xbf16>, vector<8x16x8xbf16>, vector<8x16x8xbf16>, vector<8x16x8xbf16>, vector<8x16x8xbf16> -> vector<8x16x72xbf16>
    %22 = vector.shape_cast %21 : vector<8x16x72xbf16> to vector<128x72xbf16>
    %c0_8 = arith.constant 0 : index
    %c0_9 = arith.constant 0 : index
    %23 = vector.load %arg4[%c0_8, %c0_9] : memref<72x8xbf16, #tpu.memory_space<vmem>>, vector<72x8xbf16>
    %cst_10 = arith.constant dense<0.000000e+00> : vector<128x8xf32>
    %24 = tpu.matmul %22, %23, %cst_10 {dimension_numbers = #tpu.dot_dimension_numbers<[1], [0], [0], [1], [0, 0, 1, 1], [], []>} : vector<128x72xbf16>, vector<72x8xbf16>, vector<128x8xf32> -> vector<128x8xf32>
    %25 = arith.truncf %24 : vector<128x8xf32> to vector<128x8xbf16>
    %c0_11 = arith.constant 0 : index
    %c0_12 = arith.constant 0 : index
    %c0_13 = arith.constant 0 : index
    %26 = vector.load %arg5[%c0_11, %c0_12, %c0_13] : memref<1x128x8xbf16, #tpu.memory_space<vmem>>, vector<1x128x8xbf16>
    %27 = vector.shape_cast %26 : vector<1x128x8xbf16> to vector<128x8xbf16>
    %28 = vector.shape_cast %25 : vector<128x8xbf16> to vector<1x128x8xbf16>
    tpu.vector_store %arg5[%c0_11, %c0_12, %c0_13], %28 {strides = array<i32>} : memref<1x128x8xbf16, #tpu.memory_space<vmem>>, vector<1x128x8xbf16>,
    %cst_14 = arith.constant dense<0.000000e+00> : vector<8xf32>
    %29 = vector.multi_reduction <add>, %24, %cst_14 [0] : vector<128x8xf32> to vector<8xf32>
    %30 = vector.shape_cast %29 : vector<8xf32> to vector<1x8xf32>
    %c0_15 = arith.constant 0 : index
    %c0_16 = arith.constant 0 : index
    %c0_17 = arith.constant 0 : index
    %c0_18 = arith.constant 0 : index
    %31 = vector.load %arg6[%c0_15, %c0_16, %c0_17, %c0_18] : memref<1x1x1x8xf32, #tpu.memory_space<vmem>>, vector<1x1x1x8xf32>
    %32 = vector.shape_cast %31 : vector<1x1x1x8xf32> to vector<1x8xf32>
    %33 = vector.shape_cast %30 : vector<1x8xf32> to vector<1x1x1x8xf32>
    tpu.vector_store %arg6[%c0_15, %c0_16, %c0_17, %c0_18], %33 {strides = array<i32>} : memref<1x1x1x8xf32, #tpu.memory_space<vmem>>, vector<1x1x1x8xf32>,
    %34 = arith.mulf %24, %24 : vector<128x8xf32>
    %cst_19 = arith.constant dense<0.000000e+00> : vector<8xf32>
    %35 = vector.multi_reduction <add>, %34, %cst_19 [0] : vector<128x8xf32> to vector<8xf32>
    %36 = vector.shape_cast %35 : vector<8xf32> to vector<1x8xf32>
    %c0_20 = arith.constant 0 : index
    %c0_21 = arith.constant 0 : index
    %c0_22 = arith.constant 0 : index
    %c0_23 = arith.constant 0 : index
    %37 = vector.load %arg7[%c0_20, %c0_21, %c0_22, %c0_23] : memref<1x1x1x8xf32, #tpu.memory_space<vmem>>, vector<1x1x1x8xf32>
    %38 = vector.shape_cast %37 : vector<1x1x1x8xf32> to vector<1x8xf32>
    %39 = vector.shape_cast %36 : vector<1x8xf32> to vector<1x1x1x8xf32>
    tpu.vector_store %arg7[%c0_20, %c0_21, %c0_22, %c0_23], %39 {strides = array<i32>} : memref<1x1x1x8xf32, #tpu.memory_space<vmem>>, vector<1x1x1x8xf32>,
    return
  }
  func.func @transform_0(%arg0: i32, %arg1: i32) -> (i32, i32, i32, i32) {
    %c0_i32 = arith.constant 0 : i32
    %c0_i32_0 = arith.constant 0 : i32
    %c0_i32_1 = arith.constant 0 : i32
    return %arg0, %arg1, %c0_i32, %c0_i32_0 : i32, i32, i32, i32
  }
  func.func @transform_1(%arg0: i32, %arg1: i32) -> (i32, i32, i32, i32, i32) {
    %c0_i32 = arith.constant 0 : i32
    %c0_i32_0 = arith.constant 0 : i32
    %c0_i32_1 = arith.constant 0 : i32
    %c0_i32_2 = arith.constant 0 : i32
    return %arg0, %arg1, %c0_i32, %c0_i32_0, %c0_i32_1 : i32, i32, i32, i32, i32
  }
  func.func @transform_2(%arg0: i32, %arg1: i32) -> (i32, i32) {
    %c0_i32 = arith.constant 0 : i32
    %c0_i32_0 = arith.constant 0 : i32
    %c0_i32_1 = arith.constant 0 : i32
    return %c0_i32, %c0_i32_0 : i32, i32
  }
  func.func @transform_3(%arg0: i32, %arg1: i32) -> (i32, i32, i32) {
    %c0_i32 = arith.constant 0 : i32
    %c0_i32_0 = arith.constant 0 : i32
    return %arg0, %arg1, %c0_i32 : i32, i32, i32
  }
  func.func @transform_4(%arg0: i32, %arg1: i32) -> (i32, i32, i32, i32) {
    %c0_i32 = arith.constant 0 : i32
    %c0_i32_0 = arith.constant 0 : i32
    %c0_i32_1 = arith.constant 0 : i32
    return %arg0, %arg1, %c0_i32, %c0_i32_0 : i32, i32, i32, i32
  }
  func.func @transform_5(%arg0: i32, %arg1: i32) -> (i32, i32, i32, i32) {
    %c0_i32 = arith.constant 0 : i32
    %c0_i32_0 = arith.constant 0 : i32
    %c0_i32_1 = arith.constant 0 : i32
    return %arg0, %arg1, %c0_i32, %c0_i32_0 : i32, i32, i32, i32
  }
}

module attributes {stable_mosaic.version = 11 : i64} {
  func.func @_bn_relu_kernel(%arg0: i32, %arg1: i32, %arg2: memref<1x128x8xbf16, #tpu.memory_space<vmem>>, %arg3: memref<1x8xf32, #tpu.memory_space<vmem>>, %arg4: memref<1x8xf32, #tpu.memory_space<vmem>>, %arg5: memref<1x128x8xf32, #tpu.memory_space<vmem>>) attributes {dimension_semantics = [#tpu.dimension_semantics<parallel>, #tpu.dimension_semantics<parallel>], iteration_bounds = array<i64: 2, 2>, scalar_prefetch = 0 : i64, scratch_operands = 0 : i64, tpu.core_type = #tpu.core_type<tc>, window_params = [{transform_indices = @transform_0, window_bounds = array<i64: 1, 128, 8>}, {pipeline_mode = #tpu.pipeline_mode<synchronous>, transform_indices = @transform_1, window_bounds = array<i64: 1, 8>}, {pipeline_mode = #tpu.pipeline_mode<synchronous>, transform_indices = @transform_2, window_bounds = array<i64: 1, 8>}, {transform_indices = @transform_3, window_bounds = array<i64: 1, 128, 8>}]} {
    %c0 = arith.constant 0 : index
    %c0_0 = arith.constant 0 : index
    %c0_1 = arith.constant 0 : index
    %0 = vector.load %arg2[%c0, %c0_0, %c0_1] : memref<1x128x8xbf16, #tpu.memory_space<vmem>>, vector<1x128x8xbf16>
    %1 = arith.extf %0 : vector<1x128x8xbf16> to vector<1x128x8xf32>
    %c0_2 = arith.constant 0 : index
    %c0_3 = arith.constant 0 : index
    %2 = vector.load %arg3[%c0_2, %c0_3] : memref<1x8xf32, #tpu.memory_space<vmem>>, vector<1x8xf32>
    %3 = vector.shape_cast %2 : vector<1x8xf32> to vector<1x1x8xf32>
    %4 = vector.broadcast %3 : vector<1x1x8xf32> to vector<1x128x8xf32>
    %5 = arith.mulf %1, %4 : vector<1x128x8xf32>
    %c0_4 = arith.constant 0 : index
    %c0_5 = arith.constant 0 : index
    %6 = vector.load %arg4[%c0_4, %c0_5] : memref<1x8xf32, #tpu.memory_space<vmem>>, vector<1x8xf32>
    %7 = vector.shape_cast %6 : vector<1x8xf32> to vector<1x1x8xf32>
    %8 = vector.broadcast %7 : vector<1x1x8xf32> to vector<1x128x8xf32>
    %9 = arith.addf %5, %8 : vector<1x128x8xf32>
    %cst = arith.constant 0.000000e+00 : f32
    %10 = vector.broadcast %cst : f32 to vector<1x128x8xf32>
    %11 = arith.maximumf %9, %10 : vector<1x128x8xf32>
    %c0_6 = arith.constant 0 : index
    %c0_7 = arith.constant 0 : index
    %c0_8 = arith.constant 0 : index
    %12 = vector.load %arg5[%c0_6, %c0_7, %c0_8] : memref<1x128x8xf32, #tpu.memory_space<vmem>>, vector<1x128x8xf32>
    tpu.vector_store %arg5[%c0_6, %c0_7, %c0_8], %11 {strides = array<i32>} : memref<1x128x8xf32, #tpu.memory_space<vmem>>, vector<1x128x8xf32>,
    return
  }
  func.func @transform_0(%arg0: i32, %arg1: i32) -> (i32, i32, i32) {
    %c0_i32 = arith.constant 0 : i32
    %c0_i32_0 = arith.constant 0 : i32
    return %arg0, %arg1, %c0_i32 : i32, i32, i32
  }
  func.func @transform_1(%arg0: i32, %arg1: i32) -> (i32, i32) {
    %c0_i32 = arith.constant 0 : i32
    %c0_i32_0 = arith.constant 0 : i32
    %c0_i32_1 = arith.constant 0 : i32
    return %c0_i32, %c0_i32_0 : i32, i32
  }
  func.func @transform_2(%arg0: i32, %arg1: i32) -> (i32, i32) {
    %c0_i32 = arith.constant 0 : i32
    %c0_i32_0 = arith.constant 0 : i32
    %c0_i32_1 = arith.constant 0 : i32
    return %c0_i32, %c0_i32_0 : i32, i32
  }
  func.func @transform_3(%arg0: i32, %arg1: i32) -> (i32, i32, i32) {
    %c0_i32 = arith.constant 0 : i32
    %c0_i32_0 = arith.constant 0 : i32
    return %arg0, %arg1, %c0_i32 : i32, i32, i32
  }
}

module attributes {stable_mosaic.version = 11 : i64} {
  func.func @_conv_kernel(%arg0: i32, %arg1: i32, %arg2: memref<1x8x16x8xbf16, #tpu.memory_space<vmem>>, %arg3: memref<1x1x2x16x8xbf16, #tpu.memory_space<vmem>>, %arg4: memref<72x8xbf16, #tpu.memory_space<vmem>>, %arg5: memref<1x8xf32, #tpu.memory_space<vmem>>, %arg6: memref<1x8xf32, #tpu.memory_space<vmem>>, %arg7: memref<1x128x8xbf16, #tpu.memory_space<vmem>>, %arg8: memref<1x1x1x8xf32, #tpu.memory_space<vmem>>, %arg9: memref<1x1x1x8xf32, #tpu.memory_space<vmem>>) attributes {dimension_semantics = [#tpu.dimension_semantics<parallel>, #tpu.dimension_semantics<parallel>], iteration_bounds = array<i64: 2, 2>, scalar_prefetch = 0 : i64, scratch_operands = 0 : i64, tpu.core_type = #tpu.core_type<tc>, window_params = [{transform_indices = @transform_0, window_bounds = array<i64: 1, 8, 16, 8>}, {transform_indices = @transform_1, window_bounds = array<i64: 1, 1, 2, 16, 8>}, {pipeline_mode = #tpu.pipeline_mode<synchronous>, transform_indices = @transform_2, window_bounds = array<i64: 72, 8>}, {pipeline_mode = #tpu.pipeline_mode<synchronous>, transform_indices = @transform_3, window_bounds = array<i64: 1, 8>}, {pipeline_mode = #tpu.pipeline_mode<synchronous>, transform_indices = @transform_4, window_bounds = array<i64: 1, 8>}, {transform_indices = @transform_5, window_bounds = array<i64: 1, 128, 8>}, {transform_indices = @transform_6, window_bounds = array<i64: 1, 1, 1, 8>}, {transform_indices = @transform_7, window_bounds = array<i64: 1, 1, 1, 8>}]} {
    %c0 = arith.constant 0 : index
    %c0_0 = arith.constant 0 : index
    %c0_1 = arith.constant 0 : index
    %c0_2 = arith.constant 0 : index
    %0 = vector.load %arg2[%c0, %c0_0, %c0_1, %c0_2] : memref<1x8x16x8xbf16, #tpu.memory_space<vmem>>, vector<1x8x16x8xbf16>
    %1 = vector.shape_cast %0 : vector<1x8x16x8xbf16> to vector<8x16x8xbf16>
    %c0_3 = arith.constant 0 : index
    %c0_4 = arith.constant 0 : index
    %c0_5 = arith.constant 0 : index
    %c0_6 = arith.constant 0 : index
    %c0_7 = arith.constant 0 : index
    %2 = vector.load %arg3[%c0_3, %c0_4, %c0_5, %c0_6, %c0_7] : memref<1x1x2x16x8xbf16, #tpu.memory_space<vmem>>, vector<1x1x2x16x8xbf16>
    %3 = vector.shape_cast %2 : vector<1x1x2x16x8xbf16> to vector<2x16x8xbf16>
    %4 = vector.extract_strided_slice %3 {offsets = [0, 0, 0], sizes = [1, 16, 8], strides = [1, 1, 1]} : vector<2x16x8xbf16> to vector<1x16x8xbf16>
    %5 = vector.extract_strided_slice %3 {offsets = [1, 0, 0], sizes = [1, 16, 8], strides = [1, 1, 1]} : vector<2x16x8xbf16> to vector<1x16x8xbf16>
    %c0_8 = arith.constant 0 : index
    %c0_9 = arith.constant 0 : index
    %6 = vector.load %arg5[%c0_8, %c0_9] : memref<1x8xf32, #tpu.memory_space<vmem>>, vector<1x8xf32>
    %c0_10 = arith.constant 0 : index
    %c0_11 = arith.constant 0 : index
    %7 = vector.load %arg6[%c0_10, %c0_11] : memref<1x8xf32, #tpu.memory_space<vmem>>, vector<1x8xf32>
    %8 = arith.extf %1 : vector<8x16x8xbf16> to vector<8x16x8xf32>
    %9 = vector.shape_cast %6 : vector<1x8xf32> to vector<1x1x8xf32>
    %10 = vector.broadcast %9 : vector<1x1x8xf32> to vector<8x16x8xf32>
    %11 = arith.mulf %8, %10 : vector<8x16x8xf32>
    %12 = vector.shape_cast %7 : vector<1x8xf32> to vector<1x1x8xf32>
    %13 = vector.broadcast %12 : vector<1x1x8xf32> to vector<8x16x8xf32>
    %14 = arith.addf %11, %13 : vector<8x16x8xf32>
    %cst = arith.constant 0.000000e+00 : f32
    %15 = vector.broadcast %cst : f32 to vector<8x16x8xf32>
    %16 = arith.maximumf %14, %15 : vector<8x16x8xf32>
    %17 = arith.truncf %16 : vector<8x16x8xf32> to vector<8x16x8xbf16>
    %18 = arith.extf %4 : vector<1x16x8xbf16> to vector<1x16x8xf32>
    %19 = vector.shape_cast %6 : vector<1x8xf32> to vector<1x1x8xf32>
    %20 = vector.broadcast %19 : vector<1x1x8xf32> to vector<1x16x8xf32>
    %21 = arith.mulf %18, %20 : vector<1x16x8xf32>
    %22 = vector.shape_cast %7 : vector<1x8xf32> to vector<1x1x8xf32>
    %23 = vector.broadcast %22 : vector<1x1x8xf32> to vector<1x16x8xf32>
    %24 = arith.addf %21, %23 : vector<1x16x8xf32>
    %cst_12 = arith.constant 0.000000e+00 : f32
    %25 = vector.broadcast %cst_12 : f32 to vector<1x16x8xf32>
    %26 = arith.maximumf %24, %25 : vector<1x16x8xf32>
    %27 = arith.truncf %26 : vector<1x16x8xf32> to vector<1x16x8xbf16>
    %28 = arith.extf %5 : vector<1x16x8xbf16> to vector<1x16x8xf32>
    %29 = vector.shape_cast %6 : vector<1x8xf32> to vector<1x1x8xf32>
    %30 = vector.broadcast %29 : vector<1x1x8xf32> to vector<1x16x8xf32>
    %31 = arith.mulf %28, %30 : vector<1x16x8xf32>
    %32 = vector.shape_cast %7 : vector<1x8xf32> to vector<1x1x8xf32>
    %33 = vector.broadcast %32 : vector<1x1x8xf32> to vector<1x16x8xf32>
    %34 = arith.addf %31, %33 : vector<1x16x8xf32>
    %cst_13 = arith.constant 0.000000e+00 : f32
    %35 = vector.broadcast %cst_13 : f32 to vector<1x16x8xf32>
    %36 = arith.maximumf %34, %35 : vector<1x16x8xf32>
    %37 = arith.truncf %36 : vector<1x16x8xf32> to vector<1x16x8xbf16>
    %c0_i32 = arith.constant 0 : i32
    %38 = arith.cmpi sgt, %arg1, %c0_i32 : i32
    %39 = arith.extui %38 : i1 to i32
    %40 = arith.sitofp %39 : i32 to f32
    %41 = arith.truncf %40 : f32 to bf16
    %42 = vector.broadcast %41 : bf16 to vector<1x16x8xbf16>
    %43 = arith.mulf %27, %42 : vector<1x16x8xbf16>
    %c1_i32 = arith.constant 1 : i32
    %44 = arith.cmpi slt, %arg1, %c1_i32 : i32
    %45 = arith.extui %44 : i1 to i32
    %46 = arith.sitofp %45 : i32 to f32
    %47 = arith.truncf %46 : f32 to bf16
    %48 = vector.broadcast %47 : bf16 to vector<1x16x8xbf16>
    %49 = arith.mulf %37, %48 : vector<1x16x8xbf16>
    %50 = tpu.concatenate %43, %17, %49 in 0 : vector<1x16x8xbf16>, vector<8x16x8xbf16>, vector<1x16x8xbf16> -> vector<10x16x8xbf16>
    %cst_14 = arith.constant 0.000000e+00 : bf16
    %51 = vector.broadcast %cst_14 : bf16 to vector<10x1x8xbf16>
    %52 = tpu.concatenate %51, %50, %51 in 1 : vector<10x1x8xbf16>, vector<10x16x8xbf16>, vector<10x1x8xbf16> -> vector<10x18x8xbf16>
    %53 = vector.extract_strided_slice %52 {offsets = [0, 0, 0], sizes = [8, 18, 8], strides = [1, 1, 1]} : vector<10x18x8xbf16> to vector<8x18x8xbf16>
    %54 = vector.extract_strided_slice %53 {offsets = [0, 0, 0], sizes = [8, 16, 8], strides = [1, 1, 1]} : vector<8x18x8xbf16> to vector<8x16x8xbf16>
    %55 = vector.extract_strided_slice %53 {offsets = [0, 1, 0], sizes = [8, 16, 8], strides = [1, 1, 1]} : vector<8x18x8xbf16> to vector<8x16x8xbf16>
    %56 = vector.extract_strided_slice %53 {offsets = [0, 2, 0], sizes = [8, 16, 8], strides = [1, 1, 1]} : vector<8x18x8xbf16> to vector<8x16x8xbf16>
    %57 = vector.extract_strided_slice %52 {offsets = [1, 0, 0], sizes = [8, 18, 8], strides = [1, 1, 1]} : vector<10x18x8xbf16> to vector<8x18x8xbf16>
    %58 = vector.extract_strided_slice %57 {offsets = [0, 0, 0], sizes = [8, 16, 8], strides = [1, 1, 1]} : vector<8x18x8xbf16> to vector<8x16x8xbf16>
    %59 = vector.extract_strided_slice %57 {offsets = [0, 1, 0], sizes = [8, 16, 8], strides = [1, 1, 1]} : vector<8x18x8xbf16> to vector<8x16x8xbf16>
    %60 = vector.extract_strided_slice %57 {offsets = [0, 2, 0], sizes = [8, 16, 8], strides = [1, 1, 1]} : vector<8x18x8xbf16> to vector<8x16x8xbf16>
    %61 = vector.extract_strided_slice %52 {offsets = [2, 0, 0], sizes = [8, 18, 8], strides = [1, 1, 1]} : vector<10x18x8xbf16> to vector<8x18x8xbf16>
    %62 = vector.extract_strided_slice %61 {offsets = [0, 0, 0], sizes = [8, 16, 8], strides = [1, 1, 1]} : vector<8x18x8xbf16> to vector<8x16x8xbf16>
    %63 = vector.extract_strided_slice %61 {offsets = [0, 1, 0], sizes = [8, 16, 8], strides = [1, 1, 1]} : vector<8x18x8xbf16> to vector<8x16x8xbf16>
    %64 = vector.extract_strided_slice %61 {offsets = [0, 2, 0], sizes = [8, 16, 8], strides = [1, 1, 1]} : vector<8x18x8xbf16> to vector<8x16x8xbf16>
    %65 = tpu.concatenate %54, %55, %56, %58, %59, %60, %62, %63, %64 in 2 : vector<8x16x8xbf16>, vector<8x16x8xbf16>, vector<8x16x8xbf16>, vector<8x16x8xbf16>, vector<8x16x8xbf16>, vector<8x16x8xbf16>, vector<8x16x8xbf16>, vector<8x16x8xbf16>, vector<8x16x8xbf16> -> vector<8x16x72xbf16>
    %66 = vector.shape_cast %65 : vector<8x16x72xbf16> to vector<128x72xbf16>
    %c0_15 = arith.constant 0 : index
    %c0_16 = arith.constant 0 : index
    %67 = vector.load %arg4[%c0_15, %c0_16] : memref<72x8xbf16, #tpu.memory_space<vmem>>, vector<72x8xbf16>
    %cst_17 = arith.constant dense<0.000000e+00> : vector<128x8xf32>
    %68 = tpu.matmul %66, %67, %cst_17 {dimension_numbers = #tpu.dot_dimension_numbers<[1], [0], [0], [1], [0, 0, 1, 1], [], []>} : vector<128x72xbf16>, vector<72x8xbf16>, vector<128x8xf32> -> vector<128x8xf32>
    %69 = arith.truncf %68 : vector<128x8xf32> to vector<128x8xbf16>
    %c0_18 = arith.constant 0 : index
    %c0_19 = arith.constant 0 : index
    %c0_20 = arith.constant 0 : index
    %70 = vector.load %arg7[%c0_18, %c0_19, %c0_20] : memref<1x128x8xbf16, #tpu.memory_space<vmem>>, vector<1x128x8xbf16>
    %71 = vector.shape_cast %70 : vector<1x128x8xbf16> to vector<128x8xbf16>
    %72 = vector.shape_cast %69 : vector<128x8xbf16> to vector<1x128x8xbf16>
    tpu.vector_store %arg7[%c0_18, %c0_19, %c0_20], %72 {strides = array<i32>} : memref<1x128x8xbf16, #tpu.memory_space<vmem>>, vector<1x128x8xbf16>,
    %cst_21 = arith.constant dense<0.000000e+00> : vector<8xf32>
    %73 = vector.multi_reduction <add>, %68, %cst_21 [0] : vector<128x8xf32> to vector<8xf32>
    %74 = vector.shape_cast %73 : vector<8xf32> to vector<1x8xf32>
    %c0_22 = arith.constant 0 : index
    %c0_23 = arith.constant 0 : index
    %c0_24 = arith.constant 0 : index
    %c0_25 = arith.constant 0 : index
    %75 = vector.load %arg8[%c0_22, %c0_23, %c0_24, %c0_25] : memref<1x1x1x8xf32, #tpu.memory_space<vmem>>, vector<1x1x1x8xf32>
    %76 = vector.shape_cast %75 : vector<1x1x1x8xf32> to vector<1x8xf32>
    %77 = vector.shape_cast %74 : vector<1x8xf32> to vector<1x1x1x8xf32>
    tpu.vector_store %arg8[%c0_22, %c0_23, %c0_24, %c0_25], %77 {strides = array<i32>} : memref<1x1x1x8xf32, #tpu.memory_space<vmem>>, vector<1x1x1x8xf32>,
    %78 = arith.mulf %68, %68 : vector<128x8xf32>
    %cst_26 = arith.constant dense<0.000000e+00> : vector<8xf32>
    %79 = vector.multi_reduction <add>, %78, %cst_26 [0] : vector<128x8xf32> to vector<8xf32>
    %80 = vector.shape_cast %79 : vector<8xf32> to vector<1x8xf32>
    %c0_27 = arith.constant 0 : index
    %c0_28 = arith.constant 0 : index
    %c0_29 = arith.constant 0 : index
    %c0_30 = arith.constant 0 : index
    %81 = vector.load %arg9[%c0_27, %c0_28, %c0_29, %c0_30] : memref<1x1x1x8xf32, #tpu.memory_space<vmem>>, vector<1x1x1x8xf32>
    %82 = vector.shape_cast %81 : vector<1x1x1x8xf32> to vector<1x8xf32>
    %83 = vector.shape_cast %80 : vector<1x8xf32> to vector<1x1x1x8xf32>
    tpu.vector_store %arg9[%c0_27, %c0_28, %c0_29, %c0_30], %83 {strides = array<i32>} : memref<1x1x1x8xf32, #tpu.memory_space<vmem>>, vector<1x1x1x8xf32>,
    return
  }
  func.func @transform_0(%arg0: i32, %arg1: i32) -> (i32, i32, i32, i32) {
    %c0_i32 = arith.constant 0 : i32
    %c0_i32_0 = arith.constant 0 : i32
    %c0_i32_1 = arith.constant 0 : i32
    return %arg0, %arg1, %c0_i32, %c0_i32_0 : i32, i32, i32, i32
  }
  func.func @transform_1(%arg0: i32, %arg1: i32) -> (i32, i32, i32, i32, i32) {
    %c0_i32 = arith.constant 0 : i32
    %c0_i32_0 = arith.constant 0 : i32
    %c0_i32_1 = arith.constant 0 : i32
    %c0_i32_2 = arith.constant 0 : i32
    return %arg0, %arg1, %c0_i32, %c0_i32_0, %c0_i32_1 : i32, i32, i32, i32, i32
  }
  func.func @transform_2(%arg0: i32, %arg1: i32) -> (i32, i32) {
    %c0_i32 = arith.constant 0 : i32
    %c0_i32_0 = arith.constant 0 : i32
    %c0_i32_1 = arith.constant 0 : i32
    return %c0_i32, %c0_i32_0 : i32, i32
  }
  func.func @transform_3(%arg0: i32, %arg1: i32) -> (i32, i32) {
    %c0_i32 = arith.constant 0 : i32
    %c0_i32_0 = arith.constant 0 : i32
    %c0_i32_1 = arith.constant 0 : i32
    return %c0_i32, %c0_i32_0 : i32, i32
  }
  func.func @transform_4(%arg0: i32, %arg1: i32) -> (i32, i32) {
    %c0_i32 = arith.constant 0 : i32
    %c0_i32_0 = arith.constant 0 : i32
    %c0_i32_1 = arith.constant 0 : i32
    return %c0_i32, %c0_i32_0 : i32, i32
  }
  func.func @transform_5(%arg0: i32, %arg1: i32) -> (i32, i32, i32) {
    %c0_i32 = arith.constant 0 : i32
    %c0_i32_0 = arith.constant 0 : i32
    return %arg0, %arg1, %c0_i32 : i32, i32, i32
  }
  func.func @transform_6(%arg0: i32, %arg1: i32) -> (i32, i32, i32, i32) {
    %c0_i32 = arith.constant 0 : i32
    %c0_i32_0 = arith.constant 0 : i32
    %c0_i32_1 = arith.constant 0 : i32
    return %arg0, %arg1, %c0_i32, %c0_i32_0 : i32, i32, i32, i32
  }
  func.func @transform_7(%arg0: i32, %arg1: i32) -> (i32, i32, i32, i32) {
    %c0_i32 = arith.constant 0 : i32
    %c0_i32_0 = arith.constant 0 : i32
    %c0_i32_1 = arith.constant 0 : i32
    return %arg0, %arg1, %c0_i32, %c0_i32_0 : i32, i32, i32, i32
  }
}

</mosaic_0001>

<bundles_post_ra>
// kernel: inconv_forward.5
= control target key start
LH: loop header
LB: loop body
LE: loop exit
PB: predicated region body
PF: predicated region fallthrough
CT: control target
= control target key end

     0   :  { %s565_s12 = smov 0   ;;  %s567_s13 = smov 0   ;;  %s706_s0 = inlined_call_operand.vmem [shape: bf16[2,256,8], index: 0, kind: input, shape index: {}]   ;;  %s707_s1 = inlined_call_operand.vmem [shape: f32[1,8], index: 1, kind: input, shape index: {}]   ;;  %s708_s2 = inlined_call_operand.vmem [shape: f32[1,8], index: 2, kind: input, shape index: {}]   ;;  %s709_s3 = inlined_call_operand.vmem [shape: f32[2,256,8], index: 3, kind: output, shape index: {}]  }
   0x1   :  { %s569_s14 = smov 0   ;;  %s571_s15 = smov 0  }
   0x2   :  { %s573_s16 = smov 0  }
   0x3 LB: > { %s22_s17 = sadd.s32 1, %s535_s14  ;;  %s25_s18 = sadd.s32 1, %s539_s15  ;;  %s543_s16 = sphi %s573_s16, %s13_s16   ;;  %s539_s15 = sphi %s571_s15, %s713_s15   ;;  %s535_s14 = sphi %s569_s14, %s712_s14   ;;  %s531_s13 = sphi %s567_s13, %s711_s13   ;;  %s527_s12 = sphi %s565_s12, %s710_s12  }
   0x4   : > { %p23_p0 = scmp.ge.s32.totalorder %s22_s17, 2  ;;  %p415_p1 = scmp.ge.s32.totalorder %s543_s16, 1 }
   0x5   : > { %p158_p2 = scmp.lt.s32.totalorder %s543_s16, 5 }
   0x6   : > { %s715_s17 = smov (%p23_p0, %s22_s17), 0  ;;  %s717_s18 = smov (!%p23_p0, %s25_s18), %s539_s15 }
   0x7   : > { %p159_p3 = pnand %p415_p1, %p158_p2  ;;  %p27_p4 = scmp.ge.s32.totalorder %s717_s18, 2 }
   0x8   : > { %s416_s19 = sshll.u32 (!%p159_p3), %s527_s12, 4  ;;  %p191_p5 = scmp.lt.s32.totalorder (!%p159_p3), %s531_s13, 1  ;;  %v606_v0 = vld [vmem:[%s707_s1] ss:$0 sm:$0xff] (!%p159_p3)  ;;  %vm304_vm0 = vcmask (!%p159_p3), 64512  }
   0x9   : > { %s719_s18 = smov (%p27_p4, %s717_s18), 0  ;;  %162 = sbr.rel (%p159_p3) target bundleno = 42 (0x2a), region = 32 }
   0xa   : > { %p193_p6 = scmp.lt.s32.totalorder (!%p159_p3), %s416_s19, 31  ;;  %v615_v9 = vld [vmem:[%s708_s2] ss:$0 sm:$0xff] (!%p159_p3) }
  0x10   : > { %s721_s13 = smov (!%p191_p5, %s531_s13), 1  ;;  %s723_s19 = smov (!%p193_p6, %s416_s19), 31 }
  0x11   : > { %s417_s20 = sshll.u32 %s721_s13, 5 }
  0x12   : > { %s595_s21 = sadd.s32 %s417_s20, %s723_s19 }
  0x13   : > { %s418_s22 = sshll.u32 %s595_s21, 2  ;;  %s421_s30 = sshll.u32 %s595_s21, 3 }
  0x14   : > { %s601_s25 = scalar_lea.vmem %s706_s0, %s418_s22  ;;  %s633_s6 = scalar_lea.vmem %s709_s3, %s421_s30 }
  0x15   : > { %v427_v1 = vld [vmem:[%s601_s25] sm:$0xff]   ;;  %v458_v2 = vld [vmem:[%s601_s25 + $0x8] sm:$0xff]   ;;  %v459_v3 = vld [vmem:[%s601_s25 + $0x10] sm:$0xff]  }
  0x16   : > { %v428_v4 = vunpack.c.l.bf16 %v427_v1  ;;  %v429_v5 = vunpack.c.h.bf16 %v427_v1  ;;  %v432_v6 = vunpack.c.l.bf16 %v458_v2  ;;  %v433_v7 = vunpack.c.h.bf16 %v458_v2  ;;  %v460_v8 = vld [vmem:[%s601_s25 + $0x18] sm:$0xff]   ;;  %v461_v30 = vld [vmem:[%s601_s25 + $0x20] sm:$0xff]   ;;  %v462_v31 = vld [vmem:[%s601_s25 + $0x28] sm:$0xff]  }
  0x17   : > { %v436_v10 = vunpack.c.l.bf16 %v459_v3  ;;  %v437_v11 = vunpack.c.h.bf16 %v459_v3  ;;  %v440_v12 = vunpack.c.l.bf16 %v460_v8  ;;  %v441_v13 = vunpack.c.h.bf16 %v460_v8  ;;  %v463_v36 = vld [vmem:[%s601_s25 + $0x30] sm:$0xff]   ;;  %v464_v37 = vld [vmem:[%s601_s25 + $0x38] sm:$0xff]  }
  0x18   : > { %v249_v14 = vmul.f32 %v428_v4, %v606_v0  ;;  %v250_v15 = vmul.f32 %v429_v5, %v606_v0  ;;  %v251_v16 = vmul.f32 %v432_v6, %v606_v0  ;;  %v252_v17 = vmul.f32 %v433_v7, %v606_v0 }
  0x19   : > { %v253_v18 = vmul.f32 %v436_v10, %v606_v0  ;;  %v254_v19 = vmul.f32 %v437_v11, %v606_v0  ;;  %v255_v20 = vmul.f32 %v440_v12, %v606_v0  ;;  %v256_v21 = vmul.f32 %v441_v13, %v606_v0 }
  0x1a   : > { %v272_v22 = vadd.f32 %v615_v9, %v249_v14  ;;  %v273_v23 = vadd.f32 %v615_v9, %v250_v15  ;;  %v274_v24 = vadd.f32 %v615_v9, %v251_v16  ;;  %v275_v25 = vadd.f32 %v615_v9, %v252_v17 }
  0x1b   : > { %v276_v26 = vadd.f32 %v615_v9, %v253_v18  ;;  %v277_v27 = vadd.f32 %v615_v9, %v254_v19  ;;  %v278_v28 = vadd.f32 %v615_v9, %v255_v20  ;;  %v279_v29 = vadd.f32 %v615_v9, %v256_v21 }
  0x1c   : > { %v288_v32 = vmax.f32 %v272_v22, 0.0  ;;  %v289_v33 = vmax.f32 %v273_v23, 0.0  ;;  %v290_v34 = vmax.f32 %v274_v24, 0.0  ;;  %v291_v35 = vmax.f32 %v275_v25, 0.0 }
  0x1d   : > { %v292_v38 = vmax.f32 %v276_v26, 0.0  ;;  %v293_v39 = vmax.f32 %v277_v27, 0.0  ;;  %v294_v40 = vmax.f32 %v278_v28, 0.0  ;;  %v295_v41 = vmax.f32 %v279_v29, 0.0 }
  0x1e   : > { %305 = vst.msk [vmem:[%s633_s6] sm:$0xff] %vm304_vm0, %v288_v32  ;;  %306 = vst.msk [vmem:[%s633_s6 + $0x8] sm:$0xff] %vm304_vm0, %v289_v33  ;;  %v444_v42 = vunpack.c.l.bf16 %v461_v30  ;;  %v445_v43 = vunpack.c.h.bf16 %v461_v30  ;;  %v448_v44 = vunpack.c.l.bf16 %v462_v31  ;;  %v449_v45 = vunpack.c.h.bf16 %v462_v31 }
  0x1f   : > { %307 = vst.msk [vmem:[%s633_s6 + $0x10] sm:$0xff] %vm304_vm0, %v290_v34  ;;  %308 = vst.msk [vmem:[%s633_s6 + $0x18] sm:$0xff] %vm304_vm0, %v291_v35  ;;  %v452_v46 = vunpack.c.l.bf16 %v463_v36  ;;  %v453_v47 = vunpack.c.h.bf16 %v463_v36  ;;  %v456_v48 = vunpack.c.l.bf16 %v464_v37  ;;  %v457_v49 = vunpack.c.h.bf16 %v464_v37 }
  0x20   : > { %309 = vst.msk [vmem:[%s633_s6 + $0x20] sm:$0xff] %vm304_vm0, %v292_v38  ;;  %310 = vst.msk [vmem:[%s633_s6 + $0x28] sm:$0xff] %vm304_vm0, %v293_v39  ;;  %v257_v50 = vmul.f32 %v444_v42, %v606_v0  ;;  %v258_v51 = vmul.f32 %v445_v43, %v606_v0  ;;  %v259_v52 = vmul.f32 %v448_v44, %v606_v0 }
  0x21   : > { %311 = vst.msk [vmem:[%s633_s6 + $0x30] sm:$0xff] %vm304_vm0, %v294_v40  ;;  %312 = vst.msk [vmem:[%s633_s6 + $0x38] sm:$0xff] %vm304_vm0, %v295_v41  ;;  %v260_v53 = vmul.f32 %v449_v45, %v606_v0  ;;  %v261_v54 = vmul.f32 %v452_v46, %v606_v0  ;;  %v262_v55 = vmul.f32 %v453_v47, %v606_v0 }
  0x22   : > { %v263_v56 = vmul.f32 %v456_v48, %v606_v0  ;;  %v264_v57 = vmul.f32 %v457_v49, %v606_v0  ;;  %v280_v58 = vadd.f32 %v615_v9, %v257_v50  ;;  %v281_v59 = vadd.f32 %v615_v9, %v258_v51 }
  0x23   : > { %v282_v60 = vadd.f32 %v615_v9, %v259_v52  ;;  %v283_v61 = vadd.f32 %v615_v9, %v260_v53  ;;  %v284_v62 = vadd.f32 %v615_v9, %v261_v54  ;;  %v285_v63 = vadd.f32 %v615_v9, %v262_v55 }
  0x24   : > { %v286_v0 = vadd.f32 %v615_v9, %v263_v56  ;;  %v287_v1 = vadd.f32 %v615_v9, %v264_v57  ;;  %v296_v2 = vmax.f32 %v280_v58, 0.0  ;;  %v297_v3 = vmax.f32 %v281_v59, 0.0 }
  0x25   : > { %v298_v4 = vmax.f32 %v282_v60, 0.0  ;;  %v299_v5 = vmax.f32 %v283_v61, 0.0  ;;  %v300_v6 = vmax.f32 %v284_v62, 0.0  ;;  %v301_v7 = vmax.f32 %v285_v63, 0.0 }
  0x26   : > { %v302_v8 = vmax.f32 %v286_v0, 0.0  ;;  %v303_v10 = vmax.f32 %v287_v1, 0.0  ;;  %313 = vst.msk [vmem:[%s633_s6 + $0x40] sm:$0xff] %vm304_vm0, %v296_v2  ;;  %314 = vst.msk [vmem:[%s633_s6 + $0x48] sm:$0xff] %vm304_vm0, %v297_v3 }
  0x27   : > { %315 = vst.msk [vmem:[%s633_s6 + $0x50] sm:$0xff] %vm304_vm0, %v298_v4  ;;  %316 = vst.msk [vmem:[%s633_s6 + $0x58] sm:$0xff] %vm304_vm0, %v299_v5 }
  0x28   : > { %317 = vst.msk [vmem:[%s633_s6 + $0x60] sm:$0xff] %vm304_vm0, %v300_v6  ;;  %318 = vst.msk [vmem:[%s633_s6 + $0x68] sm:$0xff] %vm304_vm0, %v301_v7 }
  0x29   : > { %319 = vst.msk [vmem:[%s633_s6 + $0x70] sm:$0xff] %vm304_vm0, %v302_v8  ;;  %320 = vst.msk [vmem:[%s633_s6 + $0x78] sm:$0xff] %vm304_vm0, %v303_v10 }
  0x2a PF: > { %s13_s16 = sadd.s32 1, %s543_s16   ;;  %s710_s12 = smov %s535_s14 }
  0x2b   : > { %p10_p7 = scmp.ge.s32.totalorder %s13_s16, 6   ;;  %s711_s13 = smov %s539_s15 }
  0x2c   : > { %s712_s14 = smov %s715_s17  ;;  %s713_s15 = smov %s719_s18 }
  0x2d   :  { %12 = sbr.rel (!%p10_p7) target bundleno = 3 (0x3), region = 62 }

// kernel: inconv_forward.3
= control target key start
LH: loop header
LB: loop body
LE: loop exit
PB: predicated region body
PF: predicated region fallthrough
CT: control target
= control target key end

     0   :  { %s1748_s18 = smov 0   ;;  %s1750_s19 = smov 0   ;;  %s2263_s0 = inlined_call_operand.vmem [shape: bf16[2,16,16,8], index: 0, kind: input, shape index: {}]   ;;  %s2264_s1 = inlined_call_operand.vmem [shape: bf16[2,2,2,16,8], index: 1, kind: input, shape index: {}]   ;;  %s2265_s2 = inlined_call_operand.vmem [shape: bf16[72,8], index: 2, kind: input, shape index: {}]   ;;  %s2266_s3 = inlined_call_operand.vmem [shape: bf16[2,256,8], index: 3, kind: output, shape index: {0}]   ;;  %s2267_s4 = inlined_call_operand.vmem [shape: f32[2,2,1,8], index: 4, kind: output, shape index: {1}]   ;;  %s2268_s5 = inlined_call_operand.vmem [shape: f32[2,2,1,8], index: 5, kind: output, shape index: {2}]  }
   0x1   :  { %s1752_s20 = smov 0   ;;  %s1754_s21 = smov 0  }
   0x2   :  { %s1756_s22 = smov 0  }
   0x3 LB: > { %s25_s23 = sadd.s32 1, %s1700_s20  ;;  %s28_s24 = sadd.s32 1, %s1704_s21  ;;  %s1708_s22 = sphi %s1756_s22, %s16_s22   ;;  %s1704_s21 = sphi %s1754_s21, %s2274_s21   ;;  %s1700_s20 = sphi %s1752_s20, %s2273_s20   ;;  %s1696_s19 = sphi %s1750_s19, %s2272_s19   ;;  %s1692_s18 = sphi %s1748_s18, %s2271_s18  }
   0x4   : > { %p26_p0 = scmp.ge.s32.totalorder %s25_s23, 2  ;;  %p1486_p1 = scmp.ge.s32.totalorder %s1708_s22, 1 }
   0x5   : > { %p234_p2 = scmp.lt.s32.totalorder %s1708_s22, 5 }
   0x6   : > { %s2276_s23 = smov (%p26_p0, %s25_s23), 0  ;;  %s2278_s24 = smov (!%p26_p0, %s28_s24), %s1704_s21 }
   0x7   : > { %p235_p3 = pnand %p1486_p1, %p234_p2  ;;  %p30_p4 = scmp.ge.s32.totalorder %s2278_s24, 2 }
   0x8   : > { %s1487_s25 = sshll.u32 (!%p235_p3), %s1692_s18, 3  ;;  %p295_p5 = scmp.lt.s32.totalorder (!%p235_p3), %s1696_s19, 1  ;;  %vm499_vm0 = vcmask (!%p235_p3), 1040384   ;;  %vm500_vm1 = vsmask.f32 (!%p235_p3), 256  ;;  %vm651_vm3 = vcmask (!%p235_p3), 1046528  }
   0x9   : > { %s2280_s24 = smov (%p30_p4, %s2278_s24), 0  ;;  %238 = sbr.rel (%p235_p3) target bundleno = 508 (0x1fc), region = 32 }
   0xa   : > { %p297_p6 = scmp.lt.s32.totalorder (!%p235_p3), %s1487_s25, 15  ;;  %p307_p7 = scmp.lt.s32.totalorder (!%p235_p3), %s1692_s18, 1  ;;  %vm1800_vm2 = vmand (!%p235_p3), %vm499_vm0, %vm500_vm1  ;;  %v1665_v41 = vld [vmem:[%s2265_s2] sm:$0xff] (!%p235_p3)   ;;  %v1666_v42 = vld [vmem:[%s2265_s2 + $0x8] sm:$0xff] (!%p235_p3)   ;;  %vm522_vm4 = vsmask.f32 (!%p235_p3), 7424 }
   0xb   : > { %s1710_s16 = smov (!%p235_p3), 24   ;;  %s1711_s17 = smov (!%p235_p3), 48   ;;  %1569 = vmatprep.subr.bf16.mxu0 (!%p235_p3), %v1665_v41  ;;  %1595 = vmatprep.subr.bf16.mxu1 (!%p235_p3), %v1665_v41  ;;  %v1667_v60 = vld [vmem:[%s2265_s2 + $0x10] sm:$0xff] (!%p235_p3)   ;;  %vm1011_vm5 = vcmask (!%p235_p3), 1043456   ;;  %vm822_vm6 = vcmask (!%p235_p3), 64512   ;;  %vm839_vm7 = vcmask (!%p235_p3), 130048  }
   0xc   : > { %s1712_s30 = smov (!%p235_p3), 40   ;;  %s1713_s6 = smov (!%p235_p3), 16   ;;  %1570 = vmatpush3.bf16.msra.mxu0 (!%p235_p3), %v1665_v41  ;;  %1600 = vmatpush3.bf16.msra.mxu1 (!%p235_p3), %v1665_v41  ;;  %vm856_vm8 = vcmask (!%p235_p3), 195584   ;;  %vm873_vm9 = vcmask (!%p235_p3), 261120   ;;  %vm890_vm10 = vcmask (!%p235_p3), 326656   ;;  %vm907_vm11 = vcmask (!%p235_p3), 392192  }
   0xd   : > { %1571 = vmatprep.subr.bf16.mxu0 (!%p235_p3), %v1666_v42  ;;  %1596 = vmatprep.subr.bf16.mxu1 (!%p235_p3), %v1666_v42  ;;  %s1716_s14 = smov (!%p235_p3), 56   ;;  %vm924_vm12 = vcmask (!%p235_p3), 457728   ;;  %vm941_vm13 = vcmask (!%p235_p3), 523264   ;;  %vm994_vm14 = vcmask (!%p235_p3), 588800   ;;  %vm1176_vm15 = vcmask (!%p235_p3), 60416  }
   0xe   : > { %vm1230_vm0 = vcmask (!%p235_p3), 57344  }
  0x10   : > { %s2282_s19 = smov (!%p295_p5, %s1696_s19), 1  ;;  %s2284_s25 = smov (!%p297_p6, %s1487_s25), 15  ;;  %1572 = vmatpush3.bf16.msra.mxu0 %v1666_v42  ;;  %1601 = vmatpush3.bf16.msra.mxu1 %v1666_v42 }
  0x11   : > { %s1489_s26 = sshll.u32 %s2282_s19, 5  ;;  %s1488_s27 = sshll.u32 %s2284_s25, 1  ;;  %1573 = vmatprep.subr.bf16.mxu0 %v1667_v60  ;;  %1597 = vmatprep.subr.bf16.mxu1 %v1667_v60 }
  0x12   : > { %s301_s28 = sadd.s32 %s1489_s26, %s1488_s27  ;;  %s1492_s9 = sshll.u32 %s2282_s19, 3 }
  0x13   : > { %s1490_s29 = sshll.u32 %s301_s28, 2 }
  0x14   : > { %s1790_s7 = scalar_lea.vmem %s2263_s0, %s1490_s29  ;;  %1574 = vmatpush3.bf16.msra.mxu0 %v1667_v60  ;;  %1602 = vmatpush3.bf16.msra.mxu1 %v1667_v60 }
  0x15   : > { %v1655_v0 = vld [vmem:[%s1790_s7 + $0x8] sm:$0xff]   ;;  %s1794_s8 = scalar_select %p307_p7, %s1692_s18, 1  ;;  %v1656_v1 = vld [vmem:[%s1790_s7] sm:$0xff]   ;;  %v1657_v6 = vld [vmem:[%s1790_s7 + $0x10] sm:$0xff]  }
  0x16   : > { %v424_v2 = vshrl.u32 %v1655_v0, 16  ;;  %v427_v3 = vshll.u32 %v1655_v0, 16  ;;  %v417_v4 = vshrl.u32 %v1656_v1, 16  ;;  %v420_v5 = vshll.u32 %v1656_v1, 16  ;;  %v1855_v45 = vld [vmem:[%s1790_s7 + $0x18] sm:$0xff]   ;;  %v1661_v46 = vld [vmem:[%s1790_s7 + $0x28] sm:$0xff]  }
  0x17   : > { %s1491_s10 = sshll.u32 %s1794_s8, 2  ;;  %v431_v10 = vshrl.u32 %v1657_v6, 16  ;;  %v434_v11 = vshll.u32 %v1657_v6, 16  ;;  %v438_v58 = vshrl.u32 %v1855_v45, 16  ;;  %v452_v59 = vshrl.u32 %v1661_v46, 16 }
  0x18   : > { %v426_v7 = vrot.slane %v424_v2, 7  ;;  %s311_s11 = sadd.s32 %s1492_s9, %s1491_s10  ;;  %v419_v9 = vrot.slane %v417_v4, 7  ;;  %v455_v4 = vshll.u32 %v1661_v46, 16 }
  0x19   : > { %s1493_s12 = sshll.u32 %s311_s11, 2  ;;  %v433_v14 = vrot.slane %v431_v10, 7  ;;  %s1714_s11 = smov 8   ;;  %v440_v10 = vrot.slane %v438_v58, 7 }
  0x1a   : > { %v429_v12 = vor.u32 %v427_v3, %v426_v7  ;;  %s1807_s15 = scalar_lea.vmem %s2264_s1, %s1493_s12  ;;  %v422_v13 = vor.u32 %v420_v5, %v419_v9  ;;  %v513_v17 = vsel %vm1800_vm2, %v419_v9, 0  ;;  %v514_v29 = vsel %vm1800_vm2, %v426_v7, 0 }
  0x1b   : > { %v1658_v15 = vld [vmem:[%s1807_s15] sm:$0xff]   ;;  %v436_v19 = vor.u32 %v434_v11, %v433_v14  ;;  %v656_v25 = vrot.slane %v513_v17, 1  ;;  %v543_v33 = vshll.u32 %v513_v17, 16  ;;  %v659_v43 = vrot.slane %v514_v29, 1  ;;  %v1662_v17 = vld [vmem:[%s1790_s7 + $0x30] sm:$0xff]  }
  0x1c   : > { %v1812_v16 = vsel %vm1800_vm2, 0, %v429_v12  ;;  %v1820_v18 = vsel %vm1800_vm2, 0, %v422_v13  ;;  %v410_v20 = vshrl.u32 %v1658_v15, 16  ;;  %v413_v21 = vshll.u32 %v1658_v15, 16  ;;  %v1881_v12 = vld [vmem:[%s1790_s7 + $0x20] sm:$0xff]   ;;  %v1668_v15 = vld [vmem:[%s2265_s2 + $0x18] sm:$0xff]  }
  0x1d   : > { %695 = vrot.lane.b32.xlu1 %v1812_v16, %s1710_s16  ;;  %693 = vrot.lane.b32.xlu0 %v1820_v18, %s1710_s16  ;;  %v655_v22 = vrot.slane %v1820_v18, 1  ;;  %v1827_v23 = vsel %vm1800_vm2, 0, %v436_v19  ;;  %v538_v26 = vshll.u32 %v1820_v18, 16  ;;  %v536_v32 = vshrl.u32 %v1820_v18, 16 }
  0x1e   : > { %v412_v24 = vrot.slane %v410_v20, 7  ;;  %v550_v37 = vshll.u32 %v1812_v16, 16  ;;  %v555_v44 = vshll.u32 %v514_v29, 16  ;;  %v658_v50 = vrot.slane %v1812_v16, 1  ;;  %1575 = vmatprep.subr.bf16.mxu0 %v1668_v15  ;;  %1598 = vmatprep.subr.bf16.mxu1 %v1668_v15 }
  0x1f   : > { %v657_v35 = vsel %vm651_vm3, %v655_v22, %v656_v25  ;;  %v540_v36 = vrot.slane %v538_v26, 1  ;;  %v545_v52 = vrot.slane %v543_v33, 1  ;;  %v548_v53 = vshrl.u32 %v1812_v16, 16  ;;  %v1663_v22 = vld [vmem:[%s1790_s7 + $0x38] sm:$0xff]   ;;  %s1715_s7 = smov 32   ;;  %1576 = vmatpush3.bf16.msra.mxu0 %v1668_v15  ;;  %1603 = vmatpush3.bf16.msra.mxu1 %v1668_v15 }
  0x20   : > { %v415_v27 = vor.u32 %v413_v21, %v412_v24  ;;  %v512_v28 = vsel %vm1800_vm2, %v412_v24, 0  ;;  %v552_v54 = vrot.slane %v550_v37, 1  ;;  %v562_v56 = vshll.u32 %v1827_v23, 16 }
  0x21   : > { %760 = vrot.lane.b32.xlu1 %v1827_v23, %s1711_s17  ;;  %758 = vrot.lane.b32.xlu0 %v1812_v16, %s1711_s17  ;;  %v653_v30 = vrot.slane %v512_v28, 1  ;;  %v531_v31 = vshll.u32 %v512_v28, 16  ;;  %v541_v51 = vor.u32 %v540_v36, %v536_v32  ;;  %v515_v57 = vsel %vm1800_vm2, %v433_v14, 0  ;;  %v1664_v32 = vld [vmem:[%s1807_s15 + $0x8] sm:$0xff]   ;;  %s1717_s15 = smov 64  }
  0x22   : > { %v1841_v34 = vsel %vm1800_vm2, 0, %v415_v27  ;;  %v1872_v62 = vsel %vm651_vm3, %v658_v50, %v659_v43  ;;  %v557_v63 = vrot.slane %v555_v44, 1  ;;  %v560_v0 = vshrl.u32 %v1827_v23, 16 }
  0x23   : > { %v652_v38 = vrot.slane %v1841_v34, 1  ;;  %v524_v39 = vshrl.u32 %v1841_v34, 16  ;;  %v526_v40 = vshll.u32 %v1841_v34, 16  ;;  %v533_v49 = vrot.slane %v531_v31, 1 }
  0x24   : > { %v546_v1 = vsel %vm522_vm4, %v541_v51, %v545_v52  ;;  %v553_v2 = vor.u32 %v552_v54, %v548_v53  ;;  %v454_v3 = vrot.slane %v452_v59, 7  ;;  %v564_v5 = vrot.slane %v562_v56, 1 }
  0x25   : > { %v654_v47 = vsel %vm651_vm3, %v652_v38, %v653_v30  ;;  %741 = vrot.lane.b32.xlu0 %v657_v35, %s1712_s30  ;;  %v528_v48 = vrot.slane %v526_v40, 1  ;;  %v567_v6 = vshll.u32 %v515_v57, 16  ;;  %v661_v7 = vrot.slane %v1827_v23, 1 }
  0x26   : > { %676 = vrot.lane.b32.xlu1 %v654_v47, %s1713_s6  ;;  %v662_v9 = vrot.slane %v515_v57, 1  ;;  %v441_v11 = vshll.u32 %v1855_v45, 16  ;;  %v457_v13 = vor.u32 %v455_v4, %v454_v3  ;;  %v518_v14 = vsel %vm1800_vm2, %v454_v3, 0 }
  0x27   : > { %v529_v55 = vor.u32 %v528_v48, %v524_v39  ;;  %v558_v19 = vsel %vm522_vm4, %v553_v2, %v557_v63  ;;  %v603_v21 = vshll.u32 %v518_v14, 16  ;;  %v565_v24 = vor.u32 %v564_v5, %v560_v0 }
  0x28   : > { %v1895_v20 = vsel %vm1800_vm2, 0, %v457_v13  ;;  %v569_v25 = vrot.slane %v567_v6, 1  ;;  %v1899_v26 = vsel %vm651_vm3, %v661_v7, %v662_v9  ;;  %v671_v27 = vrot.slane %v518_v14, 1 }
  0x29   : > { %v534_v61 = vsel %vm522_vm4, %v529_v55, %v533_v49  ;;  %v443_v28 = vor.u32 %v441_v11, %v440_v10  ;;  %v445_v29 = vshrl.u32 %v1881_v12, 16  ;;  %v596_v30 = vshrl.u32 %v1895_v20, 16 }
  0x2a   : > { %619 = vrot.lane.b32.xlu0 %v534_v61, %s1714_s11  ;;  %678 = vrot.lane.b32.xlu1 %v657_v35, %s1713_s6  ;;  %v598_v31 = vshll.u32 %v1895_v20, 16  ;;  %v1907_v33 = vsel %vm1800_vm2, %v440_v10, 0  ;;  %v448_v35 = vshll.u32 %v1881_v12, 16  ;;  %v670_v36 = vrot.slane %v1895_v20, 1 }
  0x2b   : > { %v459_v37 = vshrl.u32 %v1662_v17, 16  ;;  %v605_v39 = vrot.slane %v603_v21, 1  ;;  %v462_v40 = vshll.u32 %v1662_v17, 16  ;;  %v466_v41 = vshrl.u32 %v1663_v22, 16 }
  0x2c   : > { %v600_v38 = vrot.slane %v598_v31, 1  ;;  %v1914_v42 = vsel %vm522_vm4, %v565_v24, %v569_v25  ;;  %v1917_v43 = vsel %vm651_vm3, %v670_v36, %v671_v27  ;;  %v469_v45 = vshll.u32 %v1663_v22, 16 }
  0x2d   : > { %v461_v44 = vrot.slane %v459_v37, 7  ;;  %v1921_v46 = vsel %vm1800_vm2, 0, %v443_v28  ;;  %v468_v48 = vrot.slane %v466_v41, 7  ;;  %v473_v49 = vshrl.u32 %v1664_v32, 16  ;;  %v1669_v37 = vld [vmem:[%s2265_s2 + $0x20] ss:$0 sps:$4 sm:$0xff]  }
  0x2e   : > { %743 = vrot.lane.b32.xlu1 %v1872_v62, %s1712_s30  ;;  %621 = vrot.lane.b32.xlu0 %v546_v1, %s1714_s11  ;;  %v601_v47 = vor.u32 %v600_v38, %v596_v30  ;;  %v1923_v50 = vrot.slane %v445_v29, 7  ;;  %v476_v53 = vshll.u32 %v1664_v32, 16  ;;  %v574_v58 = vshll.u32 %v1921_v46, 16 }
  0x2f   : > { %v464_v51 = vor.u32 %v462_v40, %v461_v44  ;;  %v519_v52 = vsel %vm1800_vm2, %v461_v44, 0  ;;  %v471_v57 = vor.u32 %v469_v45, %v468_v48  ;;  %v520_v60 = vsel %vm1800_vm2, %v468_v48, 0  ;;  %1605 = vmatprep.subr.msk.bf16.mxu0 %vm1011_vm5, %v1669_v37  ;;  %1606 = vmatprep.subr.msk.bf16.mxu1 %vm1011_vm5, %v1669_v37 }
  0x30   : > { %v1931_v54 = vsel %vm522_vm4, %v601_v47, %v605_v39  ;;  %v615_v55 = vshll.u32 %v519_v52, 16  ;;  %v674_v56 = vrot.slane %v519_v52, 1  ;;  %v475_v61 = vrot.slane %v473_v49, 7 }
  0x31   : > { %v1936_v59 = vsel %vm1800_vm2, 0, %v464_v51  ;;  %v1945_v3 = vsel %vm1800_vm2, 0, %v471_v57  ;;  %v717_v4 = vshll.u32 %v520_v60, 16  ;;  %v739_v5 = vrot.slane %v520_v60, 1 }
  0x32   : > { %723 = vrot.lane.b32.xlu1 %v558_v19, %s1715_s7  ;;  %721 = vrot.lane.b32.xlu0 %v546_v1, %s1715_s7  ;;  %v608_v63 = vshrl.u32 %v1936_v59, 16  ;;  %v610_v0 = vshll.u32 %v1936_v59, 16  ;;  %v617_v1 = vrot.slane %v615_v55, 1  ;;  %v673_v2 = vrot.slane %v1936_v59, 1 }
  0x33   : > { %v478_v6 = vor.u32 %v476_v53, %v475_v61  ;;  %v710_v10 = vshrl.u32 %v1945_v3, 16  ;;  %v712_v11 = vshll.u32 %v1945_v3, 16  ;;  %v719_v13 = vrot.slane %v717_v4, 1 }
  0x34   : > { %v612_v7 = vrot.slane %v610_v0, 1  ;;  %v1951_v9 = vsel %vm651_vm3, %v673_v2, %v674_v56  ;;  %v738_v14 = vrot.slane %v1945_v3, 1  ;;  %v521_v17 = vsel %vm1800_vm2, %v475_v61, 0 }
  0x35   : > { %v1958_v15 = vsel %vm1800_vm2, 0, %v478_v6  ;;  %v714_v21 = vrot.slane %v712_v11, 1  ;;  %v782_v27 = vshll.u32 %v521_v17, 16  ;;  %v804_v29 = vrot.slane %v521_v17, 1 }
  0x36   : > { %788 = vrot.lane.b32.xlu1 %v1914_v42, %s1716_s14  ;;  %786 = vrot.lane.b32.xlu0 %v558_v19, %s1716_s14  ;;  %v775_v22 = vshrl.u32 %v1958_v15, 16  ;;  %v777_v24 = vshll.u32 %v1958_v15, 16  ;;  %v1965_v25 = vsel %vm651_vm3, %v738_v14, %v739_v5  ;;  %v803_v28 = vrot.slane %v1958_v15, 1 }
  0x37   : > { %v579_v30 = vshll.u32 %v1907_v33, 16  ;;  %v715_v32 = vor.u32 %v714_v21, %v710_v10  ;;  %v572_v38 = vshrl.u32 %v1921_v46, 16  ;;  %v576_v39 = vrot.slane %v574_v58, 1 }
  0x38   : > { %v779_v36 = vrot.slane %v777_v24, 1  ;;  %v784_v40 = vrot.slane %v782_v27, 1  ;;  %v1981_v41 = vsel %vm651_vm3, %v803_v28, %v804_v29  ;;  %v450_v44 = vor.u32 %v448_v35, %v1923_v50 }
  0x39   : > { %v1987_v45 = vsel %vm522_vm4, %v715_v32, %v719_v13  ;;  %v1013_v49 = vsel %vm1011_vm5, %v1669_v37, 0  ;;  %v577_v51 = vor.u32 %v576_v39, %v572_v38  ;;  %v581_v52 = vrot.slane %v579_v30, 1 }
  0x3a   : > { %623 = vrot.lane.b32.xlu1 %v558_v19, %s1714_s11  ;;  %806 = vrot.lane.b32.xlu0 %v1872_v62, %s1717_s15  ;;  %v613_v19 = vor.u32 %v612_v7, %v608_v63  ;;  %v780_v47 = vor.u32 %v779_v36, %v775_v22  ;;  %v1998_v12 = vsel %vm1800_vm2, 0, %v450_v44  ;;  %v664_v35 = vrot.slane %v1921_v46, 1 }
  0x3b   : > { %1578 = vmatpush3.bf16.msra.mxu0 %v1013_v49  ;;  %1604 = vmatpush3.bf16.msra.mxu1 %v1013_v49  ;;  %v665_v53 = vrot.slane %v1907_v33, 1  ;;  %v586_v55 = vshll.u32 %v1998_v12, 16  ;;  %v517_v56 = vsel %vm1800_vm2, %v1923_v50, 0  ;;  %v584_v58 = vshrl.u32 %v1998_v12, 16 }
  0x3c   : > { %v1974_v31 = vsel %vm522_vm4, %v613_v19, %v617_v1  ;;  %v1994_v48 = vsel %vm522_vm4, %v780_v47, %v784_v40  ;;  %v591_v61 = vshll.u32 %v517_v56, 16  ;;  %v668_v50 = vrot.slane %v517_v56, 1 }
  0x3d   : > { %v666_v57 = vsel %vm651_vm3, %v664_v35, %v665_v53  ;;  %v588_v60 = vrot.slane %v586_v55, 1 }
  0x3e   : > { %625 = vrot.lane.b32.xlu1 %v1914_v42, %s1714_s11  ;;  %808 = vrot.lane.b32.xlu0 %v1899_v26, %s1717_s15  ;;  %v593_v63 = vrot.slane %v591_v61, 1 }
  0x3f   : > { %v589_v33 = vor.u32 %v588_v60, %v584_v58 }
  0x41   : > { %v594_v8 = vsel %vm522_vm4, %v589_v33, %v593_v63 }
  0x42   : > { %682 = vrot.lane.b32.xlu1 %v1899_v26, %s1713_s6  ;;  %680 = vrot.lane.b32.xlu0 %v1872_v62, %s1713_s6  ;;  %v582_v62 = vsel %vm522_vm4, %v577_v51, %v581_v52 }
  0x46   : > { %699 = vrot.lane.b32.xlu1 %v1921_v46, %s1710_s16  ;;  %697 = vrot.lane.b32.xlu0 %v1827_v23, %s1710_s16 }
  0x4a   : > { %727 = vrot.lane.b32.xlu1 %v582_v62, %s1715_s7  ;;  %725 = vrot.lane.b32.xlu0 %v1914_v42, %s1715_s7  ;;  %v667_v42 = vrot.slane %v1998_v12, 1 }
  0x4e   : > { %747 = vrot.lane.b32.xlu1 %v666_v57, %s1712_s30  ;;  %745 = vrot.lane.b32.xlu0 %v1899_v26, %s1712_s30  ;;  %v669_v26 = vsel %vm651_vm3, %v667_v42, %v668_v50 }
  0x52   : > { %764 = vrot.lane.b32.xlu1 %v1998_v12, %s1711_s17  ;;  %762 = vrot.lane.b32.xlu0 %v1921_v46, %s1711_s17 }
  0x56   : > { %792 = vrot.lane.b32.xlu1 %v594_v8, %s1716_s14  ;;  %790 = vrot.lane.b32.xlu0 %v582_v62, %s1716_s14 }
  0x5a   : > { %627 = vrot.lane.b32.xlu1 %v582_v62, %s1714_s11  ;;  %810 = vrot.lane.b32.xlu0 %v666_v57, %s1717_s15 }
  0x5e   : > { %629 = vrot.lane.b32.xlu1 %v594_v8, %s1714_s11  ;;  %812 = vrot.lane.b32.xlu0 %v669_v26, %s1717_s15 }
  0x62   : > { %686 = vrot.lane.b32.xlu1 %v669_v26, %s1713_s6  ;;  %684 = vrot.lane.b32.xlu0 %v666_v57, %s1713_s6 }
  0x66   : > { %703 = vrot.lane.b32.xlu1 %v1895_v20, %s1710_s16  ;;  %701 = vrot.lane.b32.xlu0 %v1998_v12, %s1710_s16 }
  0x6a   : > { %731 = vrot.lane.b32.xlu1 %v1931_v54, %s1715_s7  ;;  %729 = vrot.lane.b32.xlu0 %v594_v8, %s1715_s7 }
  0x6e   : > { %751 = vrot.lane.b32.xlu1 %v1917_v43, %s1712_s30  ;;  %749 = vrot.lane.b32.xlu0 %v669_v26, %s1712_s30 }
  0x72   : > { %768 = vrot.lane.b32.xlu1 %v1936_v59, %s1711_s17  ;;  %766 = vrot.lane.b32.xlu0 %v1895_v20, %s1711_s17 }
  0x76   : > { %796 = vrot.lane.b32.xlu1 %v1974_v31, %s1716_s14  ;;  %794 = vrot.lane.b32.xlu0 %v1931_v54, %s1716_s14 }
  0x7a   : > { %631 = vrot.lane.b32.xlu1 %v1931_v54, %s1714_s11  ;;  %814 = vrot.lane.b32.xlu0 %v1917_v43, %s1717_s15 }
  0x7e   : > { %633 = vrot.lane.b32.xlu1 %v1974_v31, %s1714_s11  ;;  %816 = vrot.lane.b32.xlu0 %v1951_v9, %s1717_s15 }
  0x82   : > { %690 = vrot.lane.b32.xlu1 %v1951_v9, %s1713_s6  ;;  %688 = vrot.lane.b32.xlu0 %v1917_v43, %s1713_s6 }
  0x86   : > { %707 = vrot.lane.b32.xlu1 %v1945_v3, %s1710_s16  ;;  %705 = vrot.lane.b32.xlu0 %v1936_v59, %s1710_s16  ;;  %s1494_s16 = sshll.u32 %s1692_s18, 4  ;;  %s1497_s18 = sshll.u32 %s2282_s19, 1 }
  0x87   : > { %p317_p8 = scmp.lt.s32.totalorder %s1494_s16, 31 }
  0x89   : > { %s2286_s16 = smov (!%p317_p8, %s1494_s16), 31 }
  0x8a   : > { %735 = vrot.lane.b32.xlu1 %v1987_v45, %s1715_s7  ;;  %733 = vrot.lane.b32.xlu0 %v1974_v31, %s1715_s7 }
  0x8e   : > { %755 = vrot.lane.b32.xlu1 %v1965_v25, %s1712_s30  ;;  %753 = vrot.lane.b32.xlu0 %v1951_v9, %s1712_s30 }
  0x8f   : > { %v696_v54 = vpop.permute.xlu1 %695  ;;  %v694_v43 = vpop.permute.xlu0 %693 }
  0x92   : > { %772 = vrot.lane.b32.xlu1 %v1958_v15, %s1711_s17  ;;  %770 = vrot.lane.b32.xlu0 %v1945_v3, %s1711_s17  ;;  %s320_s17 = sadd.s32 %s1489_s26, %s2286_s16  ;;  %s329_s26 = sadd.s32 %s1497_s18, %s1794_s8 }
  0x93   : > { %v761_v0 = vpop.permute.xlu1 %760  ;;  %v759_v1 = vpop.permute.xlu0 %758  ;;  %s1496_s28 = sshll.u32 %s320_s17, 2  ;;  %s330_s11 = scalar_lea.vmem %s2267_s4, %s329_s26 }
  0x94   : > { %s2174_s6 = scalar_lea.vmem %s2266_s3, %s1496_s28  ;;  %s337_s7 = scalar_lea.vmem %s2268_s5, %s329_s26 }
  0x96   : > { %800 = vrot.lane.b32.xlu1 %v1994_v48, %s1716_s14  ;;  %798 = vrot.lane.b32.xlu0 %v1987_v45, %s1716_s14 }
  0x97   : > { %v742_v2 = vpop.permute.xlu0 %741 }
  0x98   : > { %v677_v4 = vpop.permute.xlu1 %676 }
  0x9a   : > { %820 = vrot.lane.b32.xlu1 %v1981_v41, %s1717_s15  ;;  %818 = vrot.lane.b32.xlu0 %v1965_v25, %s1717_s15 }
  0x9c   : > { %v620_v5 = vpop.permute.xlu0 %619  ;;  %v679_v6 = vpop.permute.xlu1 %678 }
  0x9d   : > { %v824_v3 = vsel %vm822_vm6, %v1841_v34, %v620_v5 }
  0x9e   : > { %v841_v10 = vsel %vm839_vm7, %v824_v3, %v677_v4 }
  0x9f   : > { %v858_v17 = vsel %vm856_vm8, %v841_v10, %v694_v43 }
  0xa0   : > { %v744_v7 = vpop.permute.xlu1 %743  ;;  %v622_v9 = vpop.permute.xlu0 %621 }
  0xa1   : > { %v826_v11 = vsel %vm822_vm6, %v1820_v18, %v622_v9 }
  0xa2   : > { %v843_v13 = vsel %vm839_vm7, %v826_v11, %v679_v6 }
  0xa3   : > { %v860_v15 = vsel %vm856_vm8, %v843_v13, %v696_v54 }
  0xa4   : > { %v724_v14 = vpop.permute.xlu1 %723  ;;  %v722_v19 = vpop.permute.xlu0 %721 }
  0xa5   : > { %v875_v34 = vsel %vm873_vm9, %v858_v17, %v722_v19  ;;  %v877_v22 = vsel %vm873_vm9, %v860_v15, %v724_v14 }
  0xa6   : > { %v892_v21 = vsel %vm890_vm10, %v875_v34, %v742_v2  ;;  %v894_v27 = vsel %vm890_vm10, %v877_v22, %v744_v7 }
  0xa7   : > { %v909_v25 = vsel %vm907_vm11, %v892_v21, %v759_v1  ;;  %v911_v31 = vsel %vm907_vm11, %v894_v27, %v761_v0 }
  0xa8   : > { %v789_v24 = vpop.permute.xlu1 %788  ;;  %v787_v18 = vpop.permute.xlu0 %786 }
  0xa9   : > { %v926_v28 = vsel %vm924_vm12, %v909_v25, %v787_v18  ;;  %v928_v36 = vsel %vm924_vm12, %v911_v31, %v789_v24 }
  0xac   : > { %v624_v29 = vpop.permute.xlu1 %623  ;;  %v807_v30 = vpop.permute.xlu0 %806 }
  0xad   : > { %v943_v32 = vsel %vm941_vm13, %v926_v28, %v807_v30  ;;  %v828_v35 = vsel %vm822_vm6, %v1812_v16, %v624_v29 }
  0xae   : > { %1579 = vmatprep.mubr.msk.bf16.mxu0 %vm994_vm14, %v943_v32 }
  0xb0   : > { %v626_v37 = vpop.permute.xlu1 %625  ;;  %v809_v38 = vpop.permute.xlu0 %808 }
  0xb1   : > { %v945_v39 = vsel %vm941_vm13, %v928_v36, %v809_v38  ;;  %v830_v60 = vsel %vm822_vm6, %v1827_v23, %v626_v37 }
  0xb2   : > { %1580 = vmatmul.mubr.msk.bf16.vlgmr.msra.gmra.mrb[0].mxu0 %vm994_vm14, %v945_v39 }
  0xb4   : > { %v683_v40 = vpop.permute.xlu1 %682  ;;  %v681_v41 = vpop.permute.xlu0 %680 }
  0xb5   : > { %v845_v53 = vsel %vm839_vm7, %v828_v35, %v681_v41  ;;  %v847_v33 = vsel %vm839_vm7, %v830_v60, %v683_v40 }
  0xb8   : > { %v700_v44 = vpop.permute.xlu1 %699  ;;  %v698_v45 = vpop.permute.xlu0 %697 }
  0xb9   : > { %v862_v55 = vsel %vm856_vm8, %v845_v53, %v698_v45  ;;  %v864_v8 = vsel %vm856_vm8, %v847_v33, %v700_v44 }
  0xbc   : > { %v728_v47 = vpop.permute.xlu1 %727  ;;  %v726_v48 = vpop.permute.xlu0 %725 }
  0xbd   : > { %v879_v58 = vsel %vm873_vm9, %v862_v55, %v726_v48  ;;  %v881_v26 = vsel %vm873_vm9, %v864_v8, %v728_v47 }
  0xc0   : > { %v748_v49 = vpop.permute.xlu1 %747  ;;  %v746_v51 = vpop.permute.xlu0 %745 }
  0xc1   : > { %v896_v61 = vsel %vm890_vm10, %v879_v58, %v746_v51  ;;  %v898_v43 = vsel %vm890_vm10, %v881_v26, %v748_v49 }
  0xc4   : > { %v765_v52 = vpop.permute.xlu1 %764  ;;  %v763_v62 = vpop.permute.xlu0 %762 }
  0xc5   : > { %v913_v63 = vsel %vm907_vm11, %v896_v61, %v763_v62  ;;  %v915_v23 = vsel %vm907_vm11, %v898_v43, %v765_v52 }
  0xc8   : > { %v793_v56 = vpop.permute.xlu1 %792  ;;  %v791_v57 = vpop.permute.xlu0 %790 }
  0xc9   : > { %v930_v16 = vsel %vm924_vm12, %v913_v63, %v791_v57  ;;  %v932_v0 = vsel %vm924_vm12, %v915_v23, %v793_v56 }
  0xcc   : > { %v628_v42 = vpop.permute.xlu1 %627  ;;  %v811_v50 = vpop.permute.xlu0 %810 }
  0xcd   : > { %v947_v54 = vsel %vm941_vm13, %v930_v16, %v811_v50  ;;  %v832_v17 = vsel %vm822_vm6, %v1921_v46, %v628_v42 }
  0xce   : > { %1583 = vmatprep.mubr.msk.bf16.mxu0 %vm994_vm14, %v947_v54 }
  0xd0   : > { %v630_v1 = vpop.permute.xlu1 %629  ;;  %v813_v2 = vpop.permute.xlu0 %812 }
  0xd1   : > { %v949_v4 = vsel %vm941_vm13, %v932_v0, %v813_v2  ;;  %v834_v18 = vsel %vm822_vm6, %v1998_v12, %v630_v1 }
  0xd2   : > { %1584 = vmatmul.mubr.msk.bf16.gmra.mrb[4].mxu0 %vm994_vm14, %v949_v4 }
  0xd4   : > { %v687_v5 = vpop.permute.xlu1 %686  ;;  %v685_v6 = vpop.permute.xlu0 %684 }
  0xd5   : > { %v849_v19 = vsel %vm839_vm7, %v832_v17, %v685_v6  ;;  %v851_v27 = vsel %vm839_vm7, %v834_v18, %v687_v5 }
  0xd8   : > { %v704_v3 = vpop.permute.xlu1 %703  ;;  %v702_v7 = vpop.permute.xlu0 %701 }
  0xd9   : > { %v866_v34 = vsel %vm856_vm8, %v849_v19, %v702_v7  ;;  %v868_v29 = vsel %vm856_vm8, %v851_v27, %v704_v3 }
  0xdc   : > { %v732_v9 = vpop.permute.xlu1 %731  ;;  %v730_v10 = vpop.permute.xlu0 %729 }
  0xdd   : > { %v883_v24 = vsel %vm873_vm9, %v866_v34, %v730_v10  ;;  %v885_v32 = vsel %vm873_vm9, %v868_v29, %v732_v9 }
  0xe0   : > { %v752_v11 = vpop.permute.xlu1 %751  ;;  %v750_v13 = vpop.permute.xlu0 %749 }
  0xe1   : > { %v900_v25 = vsel %vm890_vm10, %v883_v24, %v750_v13  ;;  %v902_v37 = vsel %vm890_vm10, %v885_v32, %v752_v11 }
  0xe4   : > { %v769_v14 = vpop.permute.xlu1 %768  ;;  %v767_v15 = vpop.permute.xlu0 %766 }
  0xe5   : > { %v917_v28 = vsel %vm907_vm11, %v900_v25, %v767_v15  ;;  %v919_v12 = vsel %vm907_vm11, %v902_v37, %v769_v14 }
  0xe8   : > { %v797_v21 = vpop.permute.xlu1 %796  ;;  %v795_v22 = vpop.permute.xlu0 %794 }
  0xe9   : > { %v934_v46 = vsel %vm924_vm12, %v917_v28, %v795_v22  ;;  %v936_v38 = vsel %vm924_vm12, %v919_v12, %v797_v21 }
  0xec   : > { %v632_v30 = vpop.permute.xlu1 %631  ;;  %v815_v31 = vpop.permute.xlu0 %814 }
  0xed   : > { %v951_v36 = vsel %vm941_vm13, %v934_v46, %v815_v31  ;;  %v836_v55 = vsel %vm822_vm6, %v1895_v20, %v632_v30 }
  0xee   : > { %1587 = vmatprep.mubr.msk.bf16.mxu1 %vm994_vm14, %v951_v36 }
  0xf0   : > { %v634_v39 = vpop.permute.xlu1 %633  ;;  %v817_v40 = vpop.permute.xlu0 %816 }
  0xf1   : > { %v953_v41 = vsel %vm941_vm13, %v936_v38, %v817_v40  ;;  %v838_v56 = vsel %vm822_vm6, %v1936_v59, %v634_v39 }
  0xf2   : > { %1588 = vmatmul.mubr.msk.bf16.vlgmr.msra.gmra.mrb[0].mxu1 %vm994_vm14, %v953_v41 }
  0xf4   : > { %v691_v44 = vpop.permute.xlu1 %690  ;;  %v689_v45 = vpop.permute.xlu0 %688 }
  0xf5   : > { %v855_v57 = vsel %vm839_vm7, %v838_v56, %v691_v44  ;;  %v853_v58 = vsel %vm839_vm7, %v836_v55, %v689_v45 }
  0xf8   : > { %v708_v47 = vpop.permute.xlu1 %707  ;;  %v706_v48 = vpop.permute.xlu0 %705 }
  0xf9   : > { %v872_v60 = vsel %vm856_vm8, %v855_v57, %v708_v47  ;;  %v870_v61 = vsel %vm856_vm8, %v853_v58, %v706_v48 }
  0xfc   : > { %v736_v49 = vpop.permute.xlu1 %735  ;;  %v734_v51 = vpop.permute.xlu0 %733 }
  0xfd   : > { %v889_v8 = vsel %vm873_vm9, %v872_v60, %v736_v49  ;;  %v887_v16 = vsel %vm873_vm9, %v870_v61, %v734_v51 }
 0x100   : > { %v756_v52 = vpop.permute.xlu1 %755  ;;  %v754_v62 = vpop.permute.xlu0 %753 }
 0x101   : > { %v906_v20 = vsel %vm890_vm10, %v889_v8, %v756_v52  ;;  %v904_v59 = vsel %vm890_vm10, %v887_v16, %v754_v62 }
 0x104   : > { %v773_v35 = vpop.permute.xlu1 %772  ;;  %v771_v53 = vpop.permute.xlu0 %770 }
 0x105   : > { %v923_v42 = vsel %vm907_vm11, %v906_v20, %v773_v35  ;;  %v921_v50 = vsel %vm907_vm11, %v904_v59, %v771_v53 }
 0x108   : > { %v801_v33 = vpop.permute.xlu1 %800  ;;  %v799_v63 = vpop.permute.xlu0 %798 }
 0x109   : > { %v940_v26 = vsel %vm924_vm12, %v923_v42, %v801_v33  ;;  %v938_v54 = vsel %vm924_vm12, %v921_v50, %v799_v63 }
 0x10c   : > { %v821_v43 = vpop.permute.xlu1 %820  ;;  %v819_v23 = vpop.permute.xlu0 %818 }
 0x10d   : > { %v957_v0 = vsel %vm941_vm13, %v940_v26, %v821_v43  ;;  %v955_v1 = vsel %vm941_vm13, %v938_v54, %v819_v23 }
 0x10e   : > { %1591 = vmatprep.mubr.msk.bf16.mxu1 %vm994_vm14, %v955_v1 }
 0x10f   : > { %1592 = vmatmul.mubr.msk.bf16.gmra.mrb[4].mxu1 %vm994_vm14, %v957_v0 }
 0x185   : > { %v1581_v2 = vpop.f32.mrb[0].mxu0 }
 0x186   : > { %v1542_v4 = vpack.c.bf16 %v1581_v2, %v1581_v2  ;;  %v1049_v5 = vpop.f32.mrb[1].mxu0  ;;  %v1234_v9 = vmul.f32 %v1581_v2, %v1581_v2  ;;  %v1196_v34 = vsel %vm822_vm6, %v1581_v2, 0.0 }
 0x187   : > { %v1540_v6 = vpack.c.bf16 %v1049_v5, %v1049_v5  ;;  %v1232_v3 = vmul.f32 %v1049_v5, %v1049_v5  ;;  %v1582_v7 = vpop.f32.mrb[2].mxu0  ;;  %v1193_v13 = vsel %vm822_vm6, %v1049_v5, 0.0 }
 0x188   : > { %1179 = vst.msk [vmem:[%s2174_s6 + $0x8] sm:$0xf] %vm1176_vm15, %v1542_v4  ;;  %v1543_v10 = vpack.c.bf16 %v1582_v7, %v1582_v7  ;;  %v1052_v11 = vpop.f32.mrb[3].mxu0  ;;  %v1235_v22 = vmul.f32 %v1582_v7, %v1582_v7  ;;  %v1251_v27 = vsel %vm822_vm6, %v1234_v9, 0.0  ;;  %v1198_v28 = vsel %vm822_vm6, %v1582_v7, 0.0 }
 0x189   : > { %1177 = vst.msk [vmem:[%s2174_s6] sm:$0xf] %vm1176_vm15, %v1540_v6  ;;  %v1541_v14 = vpack.c.bf16 %v1052_v11, %v1052_v11  ;;  %v1194_v15 = vsel %vm822_vm6, %v1052_v11, 0.0  ;;  %v1233_v17 = vmul.f32 %v1052_v11, %v1052_v11  ;;  %v1248_v21 = vsel %vm822_vm6, %v1232_v3, 0.0 }
 0x18a   : > { %1180 = vst.msk [vmem:[%s2174_s6 + $0xc] sm:$0xf] %vm1176_vm15, %v1543_v10  ;;  %v1195_v19 = vadd.f32 %v1194_v15, %v1193_v13  ;;  %v1253_v30 = vsel %vm822_vm6, %v1235_v22, 0.0 }
 0x18b   : > { %1178 = vst.msk [vmem:[%s2174_s6 + $0x4] sm:$0xf] %vm1176_vm15, %v1541_v14  ;;  %v1249_v24 = vsel %vm822_vm6, %v1233_v17, 0.0 }
 0x18c   : > { %v1197_v18 = vadd.f32 %v1196_v34, %v1195_v19  ;;  %v1250_v25 = vadd.f32 %v1249_v24, %v1248_v21 }
 0x18e   : > { %v1252_v29 = vadd.f32 %v1251_v27, %v1250_v25  ;;  %v1199_v46 = vadd.f32 %v1198_v28, %v1197_v18 }
 0x190   : > { %v1254_v31 = vadd.f32 %v1253_v30, %v1252_v29 }
 0x1a5   : > { %v1585_v32 = vpop.f32.mrb[4].mxu0 }
 0x1a6   : > { %v1546_v36 = vpack.c.bf16 %v1585_v32, %v1585_v32  ;;  %v1065_v37 = vpop.f32.mrb[5].mxu0  ;;  %v1238_v51 = vmul.f32 %v1585_v32, %v1585_v32  ;;  %v1204_v53 = vsel %vm822_vm6, %v1585_v32, 0.0 }
 0x1a7   : > { %v1544_v12 = vpack.c.bf16 %v1065_v37, %v1065_v37  ;;  %v1200_v38 = vsel %vm822_vm6, %v1065_v37, 0.0  ;;  %v1236_v39 = vmul.f32 %v1065_v37, %v1065_v37  ;;  %v1586_v40 = vpop.f32.mrb[6].mxu0 }
 0x1a8   : > { %1183 = vst.msk [vmem:[%s2174_s6 + $0x18] sm:$0xf] %vm1176_vm15, %v1546_v36  ;;  %v1201_v41 = vadd.f32 %v1200_v38, %v1199_v46  ;;  %v1547_v44 = vpack.c.bf16 %v1586_v40, %v1586_v40  ;;  %v1068_v45 = vpop.f32.mrb[7].mxu0  ;;  %v1239_v55 = vmul.f32 %v1586_v40, %v1586_v40  ;;  %v1206_v58 = vsel %vm822_vm6, %v1586_v40, 0.0 }
 0x1a9   : > { %1181 = vst.msk [vmem:[%s2174_s6 + $0x10] sm:$0xf] %vm1176_vm15, %v1544_v12  ;;  %v1255_v47 = vsel %vm822_vm6, %v1236_v39, 0.0  ;;  %v1545_v48 = vpack.c.bf16 %v1068_v45, %v1068_v45  ;;  %v1202_v49 = vsel %vm822_vm6, %v1068_v45, 0.0  ;;  %v1237_v35 = vmul.f32 %v1068_v45, %v1068_v45 }
 0x1aa   : > { %v1256_v52 = vadd.f32 %v1255_v47, %v1254_v31  ;;  %1184 = vst.msk [vmem:[%s2174_s6 + $0x1c] sm:$0xf] %vm1176_vm15, %v1547_v44  ;;  %v1203_v62 = vadd.f32 %v1202_v49, %v1201_v41  ;;  %v1259_v61 = vsel %vm822_vm6, %v1238_v51, 0.0  ;;  %v1261_v8 = vsel %vm822_vm6, %v1239_v55, 0.0 }
 0x1ab   : > { %1182 = vst.msk [vmem:[%s2174_s6 + $0x14] sm:$0xf] %vm1176_vm15, %v1545_v48  ;;  %v1257_v57 = vsel %vm822_vm6, %v1237_v35, 0.0 }
 0x1ac   : > { %v1205_v56 = vadd.f32 %v1204_v53, %v1203_v62  ;;  %v1258_v60 = vadd.f32 %v1257_v57, %v1256_v52 }
 0x1ae   : > { %v1207_v33 = vadd.f32 %v1206_v58, %v1205_v56  ;;  %v1260_v63 = vadd.f32 %v1259_v61, %v1258_v60 }
 0x1b0   : > { %v1262_v16 = vadd.f32 %v1261_v8, %v1260_v63 }
 0x1c5   : > { %v1589_v20 = vpop.f32.mrb[0].mxu1 }
 0x1c6   : > { %v1550_v59 = vpack.c.bf16 %v1589_v20, %v1589_v20  ;;  %v1081_v42 = vpop.f32.mrb[1].mxu1  ;;  %v1242_v6 = vmul.f32 %v1589_v20, %v1589_v20  ;;  %v1212_v10 = vsel %vm822_vm6, %v1589_v20, 0.0 }
 0x1c7   : > { %v1548_v50 = vpack.c.bf16 %v1081_v42, %v1081_v42  ;;  %v1208_v26 = vsel %vm822_vm6, %v1081_v42, 0.0  ;;  %v1240_v54 = vmul.f32 %v1081_v42, %v1081_v42  ;;  %v1590_v43 = vpop.f32.mrb[2].mxu1 }
 0x1c8   : > { %1187 = vst.msk [vmem:[%s2174_s6 + $0x28] sm:$0xf] %vm1176_vm15, %v1550_v59  ;;  %v1209_v23 = vadd.f32 %v1208_v26, %v1207_v33  ;;  %v1551_v0 = vpack.c.bf16 %v1590_v43, %v1590_v43  ;;  %v1084_v1 = vpop.f32.mrb[3].mxu1  ;;  %v1243_v11 = vmul.f32 %v1590_v43, %v1590_v43  ;;  %v1214_v15 = vsel %vm822_vm6, %v1590_v43, 0.0 }
 0x1c9   : > { %1185 = vst.msk [vmem:[%s2174_s6 + $0x20] sm:$0xf] %vm1176_vm15, %v1548_v50  ;;  %v1263_v2 = vsel %vm822_vm6, %v1240_v54, 0.0  ;;  %v1549_v4 = vpack.c.bf16 %v1084_v1, %v1084_v1  ;;  %v1210_v5 = vsel %vm822_vm6, %v1084_v1, 0.0  ;;  %v1241_v9 = vmul.f32 %v1084_v1, %v1084_v1 }
 0x1ca   : > { %v1264_v3 = vadd.f32 %v1263_v2, %v1262_v16  ;;  %1188 = vst.msk [vmem:[%s2174_s6 + $0x2c] sm:$0xf] %vm1176_vm15, %v1551_v0  ;;  %v1211_v7 = vadd.f32 %v1210_v5, %v1209_v23  ;;  %v1267_v19 = vsel %vm822_vm6, %v1242_v6, 0.0  ;;  %v1269_v22 = vsel %vm822_vm6, %v1243_v11, 0.0 }
 0x1cb   : > { %1186 = vst.msk [vmem:[%s2174_s6 + $0x24] sm:$0xf] %vm1176_vm15, %v1549_v4  ;;  %v1265_v14 = vsel %vm822_vm6, %v1241_v9, 0.0 }
 0x1cc   : > { %v1213_v13 = vadd.f32 %v1212_v10, %v1211_v7  ;;  %v1266_v17 = vadd.f32 %v1265_v14, %v1264_v3 }
 0x1ce   : > { %v1215_v34 = vadd.f32 %v1214_v15, %v1213_v13  ;;  %v1268_v21 = vadd.f32 %v1267_v19, %v1266_v17 }
 0x1d0   : > { %v1270_v24 = vadd.f32 %v1269_v22, %v1268_v21 }
 0x1e2   : > { %v1593_v18 = vpop.f32.mrb[4].mxu1 }
 0x1e3   : > { %v1554_v25 = vpack.c.bf16 %v1593_v18, %v1593_v18  ;;  %v1097_v27 = vpop.f32.mrb[5].mxu1  ;;  %v1246_v39 = vmul.f32 %v1593_v18, %v1593_v18  ;;  %v1220_v45 = vsel %vm822_vm6, %v1593_v18, 0.0 }
 0x1e4   : > { %v1552_v28 = vpack.c.bf16 %v1097_v27, %v1097_v27  ;;  %v1216_v29 = vsel %vm822_vm6, %v1097_v27, 0.0  ;;  %v1244_v46 = vmul.f32 %v1097_v27, %v1097_v27  ;;  %v1594_v30 = vpop.f32.mrb[6].mxu1 }
 0x1e5   : > { %1191 = vst.msk [vmem:[%s2174_s6 + $0x38] sm:$0xf] %vm1176_vm15, %v1554_v25  ;;  %v1217_v31 = vadd.f32 %v1216_v29, %v1215_v34  ;;  %v1555_v32 = vpack.c.bf16 %v1594_v30, %v1594_v30  ;;  %v1100_v36 = vpop.f32.mrb[7].mxu1  ;;  %v1247_v47 = vmul.f32 %v1594_v30, %v1594_v30  ;;  %v1222_v51 = vsel %vm822_vm6, %v1594_v30, 0.0 }
 0x1e6   : > { %1189 = vst.msk [vmem:[%s2174_s6 + $0x30] sm:$0xf] %vm1176_vm15, %v1552_v28  ;;  %v1271_v37 = vsel %vm822_vm6, %v1244_v46, 0.0  ;;  %v1553_v12 = vpack.c.bf16 %v1100_v36, %v1100_v36  ;;  %v1218_v38 = vsel %vm822_vm6, %v1100_v36, 0.0  ;;  %v1245_v44 = vmul.f32 %v1100_v36, %v1100_v36 }
 0x1e7   : > { %v1272_v40 = vadd.f32 %v1271_v37, %v1270_v24  ;;  %1192 = vst.msk [vmem:[%s2174_s6 + $0x3c] sm:$0xf] %vm1176_vm15, %v1555_v32  ;;  %v1219_v41 = vadd.f32 %v1218_v38, %v1217_v31  ;;  %v1275_v62 = vsel %vm822_vm6, %v1246_v39, 0.0  ;;  %v1277_v55 = vsel %vm822_vm6, %v1247_v47, 0.0 }
 0x1e8   : > { %1190 = vst.msk [vmem:[%s2174_s6 + $0x34] sm:$0xf] %vm1176_vm15, %v1553_v12  ;;  %v1273_v49 = vsel %vm822_vm6, %v1245_v44, 0.0 }
 0x1e9   : > { %v1221_v48 = vadd.f32 %v1220_v45, %v1219_v41  ;;  %v1274_v52 = vadd.f32 %v1273_v49, %v1272_v40 }
 0x1eb   : > { %v1223_v35 = vadd.f32 %v1222_v51, %v1221_v48  ;;  %v1276_v53 = vadd.f32 %v1275_v62, %v1274_v52 }
 0x1ed   : > { %v1224_v56 = vrot.slane %v1223_v35, 4  ;;  %v1278_v57 = vadd.f32 %v1277_v55, %v1276_v53 }
 0x1ef   : > { %v1225_v58 = vadd.f32 %v1224_v56, %v1223_v35  ;;  %v1279_v60 = vrot.slane %v1278_v57, 4 }
 0x1f1   : > { %v1226_v61 = vrot.slane %v1225_v58, 2  ;;  %v1280_v33 = vadd.f32 %v1279_v60, %v1278_v57 }
 0x1f3   : > { %v1227_v63 = vadd.f32 %v1226_v61, %v1225_v58  ;;  %v1281_v8 = vrot.slane %v1280_v33, 2 }
 0x1f5   : > { %v1228_v16 = vrot.slane %v1227_v63, 1  ;;  %v1282_v20 = vadd.f32 %v1281_v8, %v1280_v33 }
 0x1f7   : > { %v1229_v59 = vadd.f32 %v1228_v16, %v1227_v63  ;;  %v1283_v42 = vrot.slane %v1282_v20, 1 }
 0x1f9   : > { %1231 = vst.msk [vmem:[%s330_s11] sm:$0x1] %vm1230_vm0, %v1229_v59  ;;  %v1284_v50 = vadd.f32 %v1283_v42, %v1282_v20 }
 0x1fb   : > { %1285 = vst.msk [vmem:[%s337_s7] sm:$0x1] %vm1230_vm0, %v1284_v50 }
 0x1fc PF: > { %s16_s22 = sadd.s32 1, %s1708_s22   ;;  %s2271_s18 = smov %s1700_s20 }
 0x1fd   : > { %p13_p9 = scmp.ge.s32.totalorder %s16_s22, 6   ;;  %s2272_s19 = smov %s1704_s21 }
 0x1fe   : > { %s2273_s20 = smov %s2276_s23  ;;  %s2274_s21 = smov %s2280_s24 }
 0x1ff   :  { %15 = sbr.rel (!%p13_p9) target bundleno = 3 (0x3), region = 89 }

// kernel: inconv_forward.4
= control target key start
LH: loop header
LB: loop body
LE: loop exit
PB: predicated region body
PF: predicated region fallthrough
CT: control target
= control target key end

     0   :  { %s1932_s24 = smov 0   ;;  %s1934_s25 = smov 0   ;;  %s2533_s0 = inlined_call_operand.vmem [shape: bf16[2,16,16,8], index: 0, kind: input, shape index: {}]   ;;  %s2534_s1 = inlined_call_operand.vmem [shape: bf16[2,2,2,16,8], index: 1, kind: input, shape index: {}]   ;;  %s2535_s2 = inlined_call_operand.vmem [shape: bf16[72,8], index: 2, kind: input, shape index: {}]   ;;  %s2536_s3 = inlined_call_operand.vmem [shape: f32[1,8], index: 3, kind: input, shape index: {}]   ;;  %s2537_s4 = inlined_call_operand.vmem [shape: f32[1,8], index: 4, kind: input, shape index: {}]   ;;  %s2538_s5 = inlined_call_operand.vmem [shape: bf16[2,256,8], index: 5, kind: output, shape index: {0}]   ;;  %s2539_s6 = inlined_call_operand.vmem [shape: f32[2,2,1,8], index: 6, kind: output, shape index: {1}]   ;;  %s2540_s7 = inlined_call_operand.vmem [shape: f32[2,2,1,8], index: 7, kind: output, shape index: {2}]  }
   0x1   :  { %s1936_s26 = smov 0   ;;  %s1938_s27 = smov 0  }
   0x2   :  { %s1940_s28 = smov 0  }
   0x3 LB: > { %s27_s29 = sadd.s32 1, %s1874_s26  ;;  %s30_s30 = sadd.s32 1, %s1878_s27  ;;  %s1882_s28 = sphi %s1940_s28, %s18_s28   ;;  %s1878_s27 = sphi %s1938_s27, %s2546_s27   ;;  %s1874_s26 = sphi %s1936_s26, %s2545_s26   ;;  %s1870_s25 = sphi %s1934_s25, %s2544_s25   ;;  %s1866_s24 = sphi %s1932_s24, %s2543_s24  }
   0x4   : > { %p28_p0 = scmp.ge.s32.totalorder %s27_s29, 2  ;;  %p1630_p1 = scmp.ge.s32.totalorder %s1882_s28, 1 }
   0x5   : > { %p284_p2 = scmp.lt.s32.totalorder %s1882_s28, 5 }
   0x6   : > { %s2548_s29 = smov (%p28_p0, %s27_s29), 0  ;;  %s2550_s30 = smov (!%p28_p0, %s30_s30), %s1878_s27 }
   0x7   : > { %p285_p3 = pnand %p1630_p1, %p284_p2  ;;  %p32_p4 = scmp.ge.s32.totalorder %s2550_s30, 2 }
   0x8   : > { %s1631_s8 = sshll.u32 (!%p285_p3), %s1866_s24, 3  ;;  %p349_p5 = scmp.lt.s32.totalorder (!%p285_p3), %s1870_s25, 1  ;;  %v1978_v0 = vld [vmem:[%s2536_s3] ss:$0 sm:$0xff] (!%p285_p3)  ;;  %vm643_vm0 = vcmask (!%p285_p3), 1040384   ;;  %vm795_vm3 = vcmask (!%p285_p3), 1046528  }
   0x9   : > { %s2552_s30 = smov (%p32_p4, %s2550_s30), 0  ;;  %288 = sbr.rel (%p285_p3) target bundleno = 517 (0x205), region = 40 }
   0xa   : > { %p351_p6 = scmp.lt.s32.totalorder (!%p285_p3), %s1631_s8, 15  ;;  %p361_p7 = scmp.lt.s32.totalorder (!%p285_p3), %s1866_s24, 1  ;;  %v1988_v9 = vld [vmem:[%s2537_s4] ss:$0 sm:$0xff] (!%p285_p3)  ;;  %vm644_vm1 = vsmask.f32 (!%p285_p3), 256 }
   0xb   : > { %p517_p8 = scmp.gt.s32.totalorder (!%p285_p3), %s1866_s24, 0  ;;  %vm2026_vm2 = vmand (!%p285_p3), %vm643_vm0, %vm644_vm1  ;;  %vm666_vm4 = vsmask.f32 (!%p285_p3), 7424  ;;  %vm1155_vm5 = vcmask (!%p285_p3), 1043456   ;;  %vm966_vm6 = vcmask (!%p285_p3), 64512   ;;  %vm983_vm7 = vcmask (!%p285_p3), 130048  }
   0xc   : > { %vm1000_vm8 = vcmask (!%p285_p3), 195584   ;;  %vm1017_vm9 = vcmask (!%p285_p3), 261120   ;;  %vm1034_vm10 = vcmask (!%p285_p3), 326656   ;;  %vm1051_vm11 = vcmask (!%p285_p3), 392192  }
   0xd   : > { %vm1068_vm12 = vcmask (!%p285_p3), 457728   ;;  %vm1085_vm13 = vcmask (!%p285_p3), 523264   ;;  %vm1138_vm14 = vcmask (!%p285_p3), 588800   ;;  %vm1320_vm15 = vcmask (!%p285_p3), 60416  }
   0xe   : > { %vm1374_vm0 = vcmask (!%p285_p3), 57344  }
  0x10   : > { %s2554_s25 = smov (!%p349_p5, %s1870_s25), 1  ;;  %s2556_s8 = smov (!%p351_p6, %s1631_s8), 15 }
  0x11   : > { %s1633_s9 = sshll.u32 %s2554_s25, 5  ;;  %s1632_s10 = sshll.u32 %s2556_s8, 1 }
  0x12   : > { %s355_s11 = sadd.s32 %s1633_s9, %s1632_s10  ;;  %s1636_s20 = sshll.u32 %s2554_s25, 3 }
  0x13   : > { %s1634_s12 = sshll.u32 %s355_s11, 2 }
  0x14   : > { %s1973_s15 = scalar_lea.vmem %s2533_s0, %s1634_s12  ;;  %s1885_s12 = smov 48  }
  0x15   : > { %v1732_v1 = vld [vmem:[%s1973_s15 + $0x8] sm:$0xff]   ;;  %v1693_v2 = vld [vmem:[%s1973_s15] sm:$0xff]   ;;  %v1733_v3 = vld [vmem:[%s1973_s15 + $0x10] sm:$0xff]   ;;  %s2005_s21 = scalar_select %p361_p7, %s1866_s24, 1 }
  0x16   : > { %v1698_v4 = vunpack.c.l.bf16 %v1732_v1  ;;  %v1699_v5 = vunpack.c.h.bf16 %v1732_v1  ;;  %v1694_v6 = vunpack.c.l.bf16 %v1693_v2  ;;  %v1695_v7 = vunpack.c.h.bf16 %v1693_v2  ;;  %v1734_v8 = vld [vmem:[%s1973_s15 + $0x18] sm:$0xff]   ;;  %s518_s22 = scalar_select %p517_p8, 1, 0 }
  0x17   : > { %v1702_v10 = vunpack.c.l.bf16 %v1733_v3  ;;  %v1703_v11 = vunpack.c.h.bf16 %v1733_v3  ;;  %v1706_v18 = vunpack.c.l.bf16 %v1734_v8  ;;  %v1707_v25 = vunpack.c.h.bf16 %v1734_v8  ;;  %s1635_s23 = sshll.u32 %s2005_s21, 2 }
  0x18   : > { %v439_v12 = vmul.f32 %v1698_v4, %v1978_v0  ;;  %v440_v13 = vmul.f32 %v1699_v5, %v1978_v0  ;;  %v437_v14 = vmul.f32 %v1694_v6, %v1978_v0  ;;  %v438_v15 = vmul.f32 %v1695_v7, %v1978_v0  ;;  %s365_s8 = sadd.s32 %s1636_s20, %s1635_s23  ;;  %s2010_s10 = scvt.s32.f32 %s518_s22  ;;  %v1735_v5 = vld [vmem:[%s1973_s15 + $0x20] sm:$0xff]  }
  0x19   : > { %v441_v16 = vmul.f32 %v1702_v10, %v1978_v0  ;;  %v442_v17 = vmul.f32 %v1703_v11, %v1978_v0  ;;  %s1637_s11 = sshll.u32 %s365_s8, 2  ;;  %v443_v34 = vmul.f32 %v1706_v18, %v1978_v0  ;;  %v444_v36 = vmul.f32 %v1707_v25, %v1978_v0  ;;  %s1884_s22 = smov 24   ;;  %v2066_v11 = vld [vmem:[%s1973_s15 + $0x28] sm:$0xff]  }
  0x1a   : > { %v461_v19 = vadd.f32 %v1988_v9, %v439_v12  ;;  %v462_v20 = vadd.f32 %v1988_v9, %v440_v13  ;;  %v459_v21 = vadd.f32 %v1988_v9, %v437_v14  ;;  %v460_v22 = vadd.f32 %v1988_v9, %v438_v15  ;;  %s2016_s14 = scalar_lea.vmem %s2534_s1, %s1637_s11  ;;  %s522_s16 = sshrl.u32 %s2010_s10, 16 }
  0x1b   : > { %v463_v23 = vadd.f32 %v1988_v9, %v441_v16  ;;  %v464_v24 = vadd.f32 %v1988_v9, %v442_v17  ;;  %v1725_v41 = vld [vmem:[%s2016_s14] sm:$0xff]   ;;  %p521_p9 = scmp.ne.f32.partialorder %s2010_s10, %s2010_s10  ;;  %s523_s17 = sand.u32 1, %s522_s16  ;;  %v465_v48 = vadd.f32 %v1988_v9, %v443_v34  ;;  %v466_v53 = vadd.f32 %v1988_v9, %v444_v36 }
  0x1c   : > { %v477_v26 = vmax.f32 %v461_v19, 0.0  ;;  %v478_v27 = vmax.f32 %v462_v20, 0.0  ;;  %v475_v28 = vmax.f32 %v459_v21, 0.0  ;;  %v476_v29 = vmax.f32 %v460_v22, 0.0  ;;  %s524_s18 = sadd.s32 32767, %s523_s17  ;;  %s1886_s16 = smov 40  }
  0x1d   : > { %v479_v30 = vmax.f32 %v463_v23, 0.0  ;;  %v480_v31 = vmax.f32 %v464_v24, 0.0  ;;  %v1726_v44 = vunpack.c.l.bf16 %v1725_v41  ;;  %v1727_v45 = vunpack.c.h.bf16 %v1725_v41  ;;  %s525_s19 = sadd.s32 %s524_s18, %s2010_s10  ;;  %s1887_s17 = smov 16  }
  0x1e   : > { %v492_v32 = vpack.c.bf16 %v478_v27, %v477_v26  ;;  %v491_v33 = vpack.c.bf16 %v476_v29, %v475_v28  ;;  %s526_s20 = sand.u32 4294901760, %s525_s19  ;;  %v481_v62 = vmax.f32 %v465_v48, 0.0  ;;  %v482_v63 = vmax.f32 %v466_v53, 0.0  ;;  %s1890_s18 = smov 32  }
  0x1f   : > { %v493_v35 = vpack.c.bf16 %v480_v31, %v479_v30  ;;  %v501_v51 = vmul.f32 %v1726_v44, %v1978_v0  ;;  %v502_v52 = vmul.f32 %v1727_v45, %v1978_v0  ;;  %s2558_s20 = smov (%p521_p9, %s526_s20), 2143289344  ;;  %v1710_v14 = vunpack.c.l.bf16 %v1735_v5  ;;  %s1891_s19 = smov 56  }
  0x20   : > { %v568_v37 = vshrl.u32 %v492_v32, 16  ;;  %v571_v38 = vshll.u32 %v492_v32, 16  ;;  %v561_v39 = vshrl.u32 %v491_v33, 16  ;;  %v564_v40 = vshll.u32 %v491_v33, 16  ;;  %s529_s23 = sshrl.u32 %s2558_s20, 16  ;;  %v1839_v32 = vld [vmem:[%s2535_s2] sm:$0xff]  }
  0x21   : > { %v575_v42 = vshrl.u32 %v493_v35, 16  ;;  %v578_v43 = vshll.u32 %v493_v35, 16  ;;  %v503_v60 = vadd.f32 %v1988_v9, %v501_v51  ;;  %v504_v61 = vadd.f32 %v1988_v9, %v502_v52  ;;  %s530_s8 = sshll.u32 %s529_s23, 16  ;;  %1753 = vmatprep.subr.bf16.mxu0 %v1839_v32  ;;  %1779 = vmatprep.subr.bf16.mxu1 %v1839_v32 }
  0x22   : > { %v570_v46 = vrot.slane %v568_v37, 7  ;;  %v563_v47 = vrot.slane %v561_v39, 7  ;;  %s531_s10 = sor.u32 %s530_s8, %s529_s23  ;;  %v1711_v15 = vunpack.c.h.bf16 %v1735_v5  ;;  %v2077_v19 = vpack.c.bf16 %v482_v63, %v481_v62  ;;  %1754 = vmatpush3.bf16.msra.mxu0 %v1839_v32  ;;  %1784 = vmatpush3.bf16.msra.mxu1 %v1839_v32  ;;  %s1888_s23 = smov 64  }
  0x23   : > { %v577_v50 = vrot.slane %v575_v42, 7  ;;  %v505_v4 = vmax.f32 %v503_v60, 0.0  ;;  %v506_v7 = vmax.f32 %v504_v61, 0.0  ;;  %v532_v8 = vstv %s531_s10  ;;  %s536_s11 = scalar_select %p361_p7, 1, 0  ;;  %v1737_v61 = vld [vmem:[%s1973_s15 + $0x30] sm:$0xff]  }
  0x24   : > { %v573_v54 = vor.u32 %v571_v38, %v570_v46  ;;  %v566_v55 = vor.u32 %v564_v40, %v563_v47  ;;  %v2036_v57 = vsel %vm2026_vm2, %v563_v47, 0  ;;  %v658_v6 = vsel %vm2026_vm2, %v570_v46, 0 }
  0x25   : > { %v580_v56 = vor.u32 %v578_v43, %v577_v50  ;;  %v800_v3 = vrot.slane %v2036_v57, 1  ;;  %v507_v12 = vpack.c.bf16 %v506_v7, %v505_v4  ;;  %v803_v18 = vrot.slane %v658_v6, 1  ;;  %s2087_s13 = scvt.s32.f32 %s536_s11  ;;  %v1841_v7 = vld [vmem:[%s2535_s2 + $0x10] sm:$0xff]  }
  0x26   : > { %v2043_v58 = vsel %vm2026_vm2, 0, %v573_v54  ;;  %v2047_v59 = vsel %vm2026_vm2, 0, %v566_v55  ;;  %v2081_v20 = vsel %vm2026_vm2, %v577_v50, 0  ;;  %v1714_v22 = vunpack.c.l.bf16 %v2066_v11  ;;  %v1840_v50 = vld [vmem:[%s2535_s2 + $0x8] sm:$0xff]  }
  0x27   : > { %839 = vrot.lane.b32.xlu1 %v2043_v58, %s1884_s22  ;;  %837 = vrot.lane.b32.xlu0 %v2047_v59, %s1884_s22  ;;  %v2057_v1 = vsel %vm2026_vm2, 0, %v580_v56  ;;  %v799_v2 = vrot.slane %v2047_v59, 1  ;;  %v694_v10 = vshll.u32 %v2043_v58, 16  ;;  %v682_v13 = vshll.u32 %v2047_v59, 16  ;;  %s540_s20 = sshrl.u32 %s2087_s13, 16  ;;  %p539_p10 = scmp.ne.f32.partialorder %s2087_s13, %s2087_s13 }
  0x28   : > { %v802_v17 = vrot.slane %v2043_v58, 1  ;;  %v534_v21 = vmul.bf16 %v532_v8, %v507_v12  ;;  %v1715_v23 = vunpack.c.h.bf16 %v2066_v11  ;;  %v692_v24 = vshrl.u32 %v2043_v58, 16  ;;  %s2132_s11 = sand.u32 1, %s540_s20  ;;  %1755 = vmatprep.subr.bf16.mxu0 %v1840_v50  ;;  %1780 = vmatprep.subr.bf16.mxu1 %v1840_v50 }
  0x29   : > { %v801_v16 = vsel %vm795_vm3, %v799_v2, %v800_v3  ;;  %v696_v25 = vrot.slane %v694_v10, 1  ;;  %v699_v26 = vshll.u32 %v658_v6, 16  ;;  %v680_v27 = vshrl.u32 %v2047_v59, 16  ;;  %1756 = vmatpush3.bf16.msra.mxu0 %v1840_v50  ;;  %1785 = vmatpush3.bf16.msra.mxu1 %v1840_v50  ;;  %s542_s20 = sadd.s32 32767, %s2132_s11 }
  0x2a   : > { %v554_v28 = vshrl.u32 %v534_v21, 16  ;;  %v557_v29 = vshll.u32 %v534_v21, 16  ;;  %v684_v30 = vrot.slane %v682_v13, 1  ;;  %v687_v31 = vshll.u32 %v2036_v57, 16  ;;  %v1738_v13 = vld [vmem:[%s1973_s15 + $0x38] sm:$0xff]   ;;  %1757 = vmatprep.subr.bf16.mxu0 %v1841_v7  ;;  %1781 = vmatprep.subr.bf16.mxu1 %v1841_v7  ;;  %s1889_s15 = smov 8   ;;  %s2160_s8 = sadd.s32 %s542_s20, %s2087_s13 }
  0x2b   : > { %904 = vrot.lane.b32.xlu1 %v2057_v1, %s1885_s12  ;;  %902 = vrot.lane.b32.xlu0 %v2043_v58, %s1885_s12  ;;  %v2096_v33 = vsel %vm795_vm3, %v802_v17, %v803_v18  ;;  %v805_v34 = vrot.slane %v2057_v1, 1  ;;  %v806_v35 = vrot.slane %v2081_v20, 1  ;;  %v582_v36 = vshrl.u32 %v2077_v19, 16 }
  0x2c   : > { %v556_v37 = vrot.slane %v554_v28, 7  ;;  %v706_v38 = vshll.u32 %v2057_v1, 16  ;;  %v585_v39 = vshll.u32 %v2077_v19, 16  ;;  %v445_v40 = vmul.f32 %v1710_v14, %v1978_v0 }
  0x2d   : > { %v697_v41 = vor.u32 %v696_v25, %v692_v24  ;;  %v701_v42 = vrot.slane %v699_v26, 1  ;;  %v711_v43 = vshll.u32 %v2081_v20, 16  ;;  %v446_v44 = vmul.f32 %v1711_v15, %v1978_v0  ;;  %1758 = vmatpush3.bf16.msra.mxu0 %v1841_v7  ;;  %v1739_v26 = vld [vmem:[%s2016_s14 + $0x8] sm:$0xff]   ;;  %1786 = vmatpush3.bf16.msra.mxu1 %v1841_v7  ;;  %s544_s14 = sand.u32 4294901760, %s2160_s8 }
  0x2e   : > { %v559_v45 = vor.u32 %v557_v29, %v556_v37  ;;  %v2113_v46 = vsel %vm2026_vm2, %v556_v37, 0  ;;  %v685_v47 = vor.u32 %v684_v30, %v680_v27  ;;  %v689_v48 = vrot.slane %v687_v31, 1  ;;  %v1842_v27 = vld [vmem:[%s2535_s2 + $0x18] sm:$0xff]   ;;  %s2560_s14 = smov (%p539_p10, %s544_s14), 2143289344 }
  0x2f   : > { %885 = vrot.lane.b32.xlu0 %v801_v16, %s1886_s16  ;;  %822 = vrot.lane.b32.xlu1 %v801_v16, %s1887_s17  ;;  %v2119_v51 = vsel %vm795_vm3, %v805_v34, %v806_v35  ;;  %v797_v52 = vrot.slane %v2113_v46, 1  ;;  %v704_v53 = vshrl.u32 %v2057_v1, 16  ;;  %v2123_v54 = vrot.slane %v582_v36, 7  ;;  %s547_s13 = sshrl.u32 %s2560_s14, 16 }
  0x30   : > { %v2127_v55 = vsel %vm2026_vm2, 0, %v559_v45  ;;  %v708_v56 = vrot.slane %v706_v38, 1  ;;  %v467_v57 = vadd.f32 %v1988_v9, %v445_v40  ;;  %v447_v60 = vmul.f32 %v1714_v22, %v1978_v0  ;;  %1759 = vmatprep.subr.bf16.mxu0 %v1842_v27  ;;  %1782 = vmatprep.subr.bf16.mxu1 %v1842_v27  ;;  %s548_s20 = sshll.u32 %s547_s13, 16 }
  0x31   : > { %v796_v62 = vrot.slane %v2127_v55, 1  ;;  %v2136_v63 = vsel %vm666_vm4, %v697_v41, %v701_v42  ;;  %v468_v2 = vadd.f32 %v1988_v9, %v446_v44  ;;  %v690_v3 = vsel %vm666_vm4, %v685_v47, %v689_v48  ;;  %1760 = vmatpush3.bf16.msra.mxu0 %v1842_v27  ;;  %1787 = vmatpush3.bf16.msra.mxu1 %v1842_v27  ;;  %s549_s8 = sor.u32 %s548_s20, %s547_s13 }
  0x32   : > { %v713_v4 = vrot.slane %v711_v43, 1  ;;  %v448_v5 = vmul.f32 %v1715_v23, %v1978_v0  ;;  %v469_v6 = vadd.f32 %v1988_v9, %v447_v60  ;;  %v670_v10 = vshll.u32 %v2127_v55, 16 }
  0x33   : > { %950 = vrot.lane.b32.xlu0 %v2096_v33, %s1888_s23  ;;  %887 = vrot.lane.b32.xlu1 %v2096_v33, %s1886_s16  ;;  %v798_v8 = vsel %vm795_vm3, %v796_v62, %v797_v52  ;;  %v1718_v11 = vunpack.c.l.bf16 %v1737_v61  ;;  %v1719_v12 = vunpack.c.h.bf16 %v1737_v61  ;;  %v709_v14 = vor.u32 %v708_v56, %v704_v53 }
  0x34   : > { %v587_v15 = vor.u32 %v585_v39, %v2123_v54  ;;  %v483_v16 = vmax.f32 %v467_v57, 0.0  ;;  %v470_v17 = vadd.f32 %v1988_v9, %v448_v5  ;;  %v484_v18 = vmax.f32 %v468_v2, 0.0 }
  0x35   : > { %v485_v19 = vmax.f32 %v469_v6, 0.0  ;;  %v449_v20 = vmul.f32 %v1718_v11, %v1978_v0  ;;  %v450_v21 = vmul.f32 %v1719_v12, %v1978_v0  ;;  %v675_v22 = vshll.u32 %v2113_v46, 16 }
  0x36   : > { %v486_v23 = vmax.f32 %v470_v17, 0.0  ;;  %v1722_v24 = vunpack.c.l.bf16 %v1738_v13  ;;  %v1723_v25 = vunpack.c.h.bf16 %v1738_v13  ;;  %v668_v28 = vshrl.u32 %v2127_v55, 16 }
  0x37   : > { %952 = vrot.lane.b32.xlu0 %v2119_v51, %s1888_s23  ;;  %820 = vrot.lane.b32.xlu1 %v798_v8, %s1887_s17  ;;  %v672_v29 = vrot.slane %v670_v10, 1  ;;  %v471_v30 = vadd.f32 %v1988_v9, %v449_v20  ;;  %v472_v31 = vadd.f32 %v1988_v9, %v450_v21  ;;  %v2171_v32 = vsel %vm666_vm4, %v709_v14, %v713_v4 }
  0x38   : > { %v496_v34 = vpack.c.bf16 %v486_v23, %v485_v19  ;;  %v451_v35 = vmul.f32 %v1722_v24, %v1978_v0  ;;  %v495_v36 = vpack.c.bf16 %v484_v18, %v483_v16  ;;  %v1730_v39 = vunpack.c.l.bf16 %v1739_v26 }
  0x39   : > { %v487_v37 = vmax.f32 %v471_v30, 0.0  ;;  %v488_v38 = vmax.f32 %v472_v31, 0.0  ;;  %v452_v42 = vmul.f32 %v1723_v25, %v1978_v0  ;;  %v673_v43 = vor.u32 %v672_v29, %v668_v28 }
  0x3a   : > { %v596_v40 = vshrl.u32 %v496_v34, 16  ;;  %v599_v41 = vshll.u32 %v496_v34, 16  ;;  %v677_v44 = vrot.slane %v675_v22, 1  ;;  %v2181_v45 = vsel %vm2026_vm2, 0, %v587_v15 }
  0x3b   : > { %765 = vrot.lane.b32.xlu0 %v690_v3, %s1889_s15  ;;  %867 = vrot.lane.b32.xlu1 %v2136_v63, %s1890_s18  ;;  %v497_v47 = vpack.c.bf16 %v488_v38, %v487_v37  ;;  %v473_v48 = vadd.f32 %v1988_v9, %v451_v35  ;;  %v474_v50 = vadd.f32 %v1988_v9, %v452_v42  ;;  %v2195_v52 = vsel %vm2026_vm2, %v2123_v54, 0 }
  0x3c   : > { %v598_v46 = vrot.slane %v596_v40, 7  ;;  %v589_v53 = vshrl.u32 %v495_v36, 16  ;;  %v1731_v56 = vunpack.c.h.bf16 %v1739_v26  ;;  %v510_v57 = vmul.f32 %v1730_v39, %v1978_v0 }
  0x3d   : > { %v603_v62 = vshrl.u32 %v497_v47, 16  ;;  %v606_v2 = vshll.u32 %v497_v47, 16  ;;  %v718_v54 = vshll.u32 %v2181_v45, 16  ;;  %v489_v5 = vmax.f32 %v473_v48, 0.0 }
  0x3e   : > { %v601_v60 = vor.u32 %v599_v41, %v598_v46  ;;  %v2202_v61 = vsel %vm2026_vm2, %v598_v46, 0  ;;  %v490_v8 = vmax.f32 %v474_v50, 0.0  ;;  %v511_v10 = vmul.f32 %v1731_v56, %v1978_v0  ;;  %v1843_v50 = vld [vmem:[%s2535_s2 + $0x20] ss:$0 sps:$4 sm:$0xff]  }
  0x3f   : > { %865 = vrot.lane.b32.xlu0 %v690_v3, %s1890_s18  ;;  %932 = vrot.lane.b32.xlu1 %v2171_v32, %s1891_s19  ;;  %v678_v3 = vsel %vm666_vm4, %v673_v43, %v677_v44  ;;  %v815_v4 = vrot.slane %v2202_v61, 1  ;;  %v605_v7 = vrot.slane %v603_v62, 7  ;;  %v716_v11 = vshrl.u32 %v2181_v45, 16 }
  0x40   : > { %v2211_v6 = vsel %vm2026_vm2, 0, %v601_v60  ;;  %v723_v12 = vshll.u32 %v2195_v52, 16  ;;  %v591_v13 = vrot.slane %v589_v53, 7  ;;  %v592_v14 = vshll.u32 %v495_v36, 16  ;;  %1789 = vmatprep.subr.msk.bf16.mxu0 %vm1155_vm5, %v1843_v50  ;;  %1790 = vmatprep.subr.msk.bf16.mxu1 %vm1155_vm5, %v1843_v50 }
  0x41   : > { %v814_v15 = vrot.slane %v2211_v6, 1  ;;  %v663_v16 = vsel %vm2026_vm2, %v605_v7, 0  ;;  %v498_v17 = vpack.c.bf16 %v490_v8, %v489_v5  ;;  %v720_v18 = vrot.slane %v718_v54, 1 }
  0x42   : > { %v759_v19 = vshll.u32 %v663_v16, 16  ;;  %v818_v20 = vrot.slane %v663_v16, 1  ;;  %v512_v0 = vadd.f32 %v1988_v9, %v510_v57  ;;  %v594_v25 = vor.u32 %v592_v14, %v591_v13 }
  0x43   : > { %930 = vrot.lane.b32.xlu0 %v2136_v63, %s1891_s19  ;;  %767 = vrot.lane.b32.xlu1 %v2136_v63, %s1889_s15  ;;  %v608_v63 = vor.u32 %v606_v2, %v605_v7  ;;  %v2225_v21 = vsel %vm795_vm3, %v814_v15, %v815_v4  ;;  %v610_v23 = vshrl.u32 %v498_v17, 16  ;;  %v613_v24 = vshll.u32 %v498_v17, 16 }
  0x44   : > { %v513_v30 = vadd.f32 %v1988_v9, %v511_v10  ;;  %v514_v31 = vmax.f32 %v512_v0, 0.0  ;;  %v721_v34 = vor.u32 %v720_v18, %v716_v11  ;;  %v725_v35 = vrot.slane %v723_v12, 1 }
  0x45   : > { %v2229_v22 = vsel %vm2026_vm2, 0, %v608_v63  ;;  %v612_v29 = vrot.slane %v610_v23, 7  ;;  %v761_v37 = vrot.slane %v759_v19, 1  ;;  %v808_v41 = vrot.slane %v2181_v45, 1 }
  0x46   : > { %v752_v26 = vshrl.u32 %v2229_v22, 16  ;;  %v754_v27 = vshll.u32 %v2229_v22, 16  ;;  %v817_v28 = vrot.slane %v2229_v22, 1  ;;  %v515_v40 = vmax.f32 %v513_v30, 0.0 }
  0x47   : > { %763 = vrot.lane.b32.xlu0 %v678_v3, %s1889_s15  ;;  %769 = vrot.lane.b32.xlu1 %v2171_v32, %s1889_s15  ;;  %v615_v39 = vor.u32 %v613_v24, %v612_v29  ;;  %v550_v43 = vstv %s549_s8  ;;  %v2249_v44 = vsel %vm2026_vm2, 0, %v594_v25  ;;  %v809_v53 = vrot.slane %v2195_v52, 1 }
  0x48   : > { %v756_v36 = vrot.slane %v754_v27, 1  ;;  %v2240_v38 = vsel %vm795_vm3, %v817_v28, %v818_v20  ;;  %v516_v48 = vpack.c.bf16 %v515_v40, %v514_v31  ;;  %v726_v62 = vsel %vm666_vm4, %v721_v34, %v725_v35 }
  0x49   : > { %v2253_v46 = vsel %vm2026_vm2, 0, %v615_v39  ;;  %v661_v2 = vsel %vm2026_vm2, %v591_v13, 0  ;;  %v730_v52 = vshll.u32 %v2249_v44, 16  ;;  %v1157_v11 = vsel %vm1155_vm5, %v1843_v50, 0 }
  0x4a   : > { %v757_v9 = vor.u32 %v756_v36, %v752_v26  ;;  %v854_v57 = vshrl.u32 %v2253_v46, 16  ;;  %v856_v60 = vshll.u32 %v2253_v46, 16  ;;  %v882_v3 = vrot.slane %v2253_v46, 1  ;;  %1762 = vmatpush3.bf16.msra.mxu0 %v1157_v11  ;;  %1788 = vmatpush3.bf16.msra.mxu1 %v1157_v11 }
  0x4b   : > { %824 = vrot.lane.b32.xlu0 %v2096_v33, %s1887_s17  ;;  %826 = vrot.lane.b32.xlu1 %v2119_v51, %s1887_s17  ;;  %v664_v33 = vsel %vm2026_vm2, %v612_v29, 0  ;;  %v552_v54 = vmul.bf16 %v550_v43, %v516_v48  ;;  %v735_v13 = vshll.u32 %v661_v2, 16  ;;  %v810_v15 = vsel %vm795_vm3, %v808_v41, %v809_v53 }
  0x4c   : > { %v861_v42 = vshll.u32 %v664_v33, 16  ;;  %v883_v47 = vrot.slane %v664_v33, 1  ;;  %v2260_v56 = vsel %vm666_vm4, %v757_v9, %v761_v37  ;;  %v858_v4 = vrot.slane %v856_v60, 1 }
  0x4d   : > { %v617_v8 = vshrl.u32 %v552_v54, 16  ;;  %v620_v10 = vshll.u32 %v552_v54, 16  ;;  %v728_v63 = vshrl.u32 %v2249_v44, 16  ;;  %v737_v0 = vrot.slane %v735_v13, 1 }
  0x4e   : > { %v863_v5 = vrot.slane %v861_v42, 1  ;;  %v2274_v7 = vsel %vm795_vm3, %v882_v3, %v883_v47  ;;  %v859_v12 = vor.u32 %v858_v4, %v854_v57  ;;  %v811_v49 = vrot.slane %v2249_v44, 1 }
  0x4f   : > { %841 = vrot.lane.b32.xlu0 %v2057_v1, %s1884_s22  ;;  %843 = vrot.lane.b32.xlu1 %v2181_v45, %s1884_s22  ;;  %v619_v14 = vrot.slane %v617_v8, 7  ;;  %v812_v34 = vrot.slane %v661_v2, 1  ;;  %v742_v37 = vshll.u32 %v2211_v6, 16  ;;  %v740_v39 = vshrl.u32 %v2211_v6, 16 }
  0x50   : > { %v2280_v16 = vsel %vm666_vm4, %v859_v12, %v863_v5  ;;  %v747_v40 = vshll.u32 %v2202_v61, 16 }
  0x51   : > { %v622_v17 = vor.u32 %v620_v10, %v619_v14  ;;  %v665_v18 = vsel %vm2026_vm2, %v619_v14, 0  ;;  %v813_v36 = vsel %vm795_vm3, %v811_v49, %v812_v34  ;;  %v744_v33 = vrot.slane %v742_v37, 1 }
  0x52   : > { %v926_v19 = vshll.u32 %v665_v18, 16  ;;  %v948_v20 = vrot.slane %v665_v18, 1  ;;  %v749_v9 = vrot.slane %v747_v40, 1 }
  0x53   : > { %869 = vrot.lane.b32.xlu0 %v2171_v32, %s1890_s18  ;;  %871 = vrot.lane.b32.xlu1 %v726_v62, %s1890_s18  ;;  %v732_v32 = vrot.slane %v730_v52, 1  ;;  %v655_v23 = vsel %vm2026_vm2, 0, %v622_v17  ;;  %v745_v41 = vor.u32 %v744_v33, %v740_v39 }
  0x54   : > { %v919_v25 = vshrl.u32 %v655_v23, 16  ;;  %v921_v26 = vshll.u32 %v655_v23, 16  ;;  %v947_v27 = vrot.slane %v655_v23, 1  ;;  %v928_v28 = vrot.slane %v926_v19, 1 }
  0x55   : > { %v733_v24 = vor.u32 %v732_v32, %v728_v63  ;;  %v750_v42 = vsel %vm666_vm4, %v745_v41, %v749_v9 }
  0x56   : > { %v949_v29 = vsel %vm795_vm3, %v947_v27, %v948_v20 }
  0x57   : > { %889 = vrot.lane.b32.xlu0 %v2119_v51, %s1886_s16  ;;  %891 = vrot.lane.b32.xlu1 %v810_v15, %s1886_s16  ;;  %v923_v51 = vrot.slane %v921_v26, 1  ;;  %v738_v30 = vsel %vm666_vm4, %v733_v24, %v737_v0 }
  0x59   : > { %v924_v31 = vor.u32 %v923_v51, %v919_v25 }
  0x5b   : > { %906 = vrot.lane.b32.xlu0 %v2181_v45, %s1885_s12  ;;  %908 = vrot.lane.b32.xlu1 %v2249_v44, %s1885_s12  ;;  %v929_v35 = vsel %vm666_vm4, %v924_v31, %v928_v28 }
  0x5f   : > { %934 = vrot.lane.b32.xlu0 %v726_v62, %s1891_s19  ;;  %936 = vrot.lane.b32.xlu1 %v738_v30, %s1891_s19 }
  0x63   : > { %954 = vrot.lane.b32.xlu0 %v810_v15, %s1888_s23  ;;  %771 = vrot.lane.b32.xlu1 %v726_v62, %s1889_s15 }
  0x67   : > { %956 = vrot.lane.b32.xlu0 %v813_v36, %s1888_s23  ;;  %773 = vrot.lane.b32.xlu1 %v738_v30, %s1889_s15 }
  0x6b   : > { %828 = vrot.lane.b32.xlu0 %v810_v15, %s1887_s17  ;;  %830 = vrot.lane.b32.xlu1 %v813_v36, %s1887_s17 }
  0x6f   : > { %845 = vrot.lane.b32.xlu0 %v2249_v44, %s1884_s22  ;;  %847 = vrot.lane.b32.xlu1 %v2211_v6, %s1884_s22 }
  0x73   : > { %873 = vrot.lane.b32.xlu0 %v738_v30, %s1890_s18  ;;  %875 = vrot.lane.b32.xlu1 %v750_v42, %s1890_s18 }
  0x77   : > { %893 = vrot.lane.b32.xlu0 %v813_v36, %s1886_s16  ;;  %895 = vrot.lane.b32.xlu1 %v2225_v21, %s1886_s16 }
  0x7b   : > { %910 = vrot.lane.b32.xlu0 %v2211_v6, %s1885_s12  ;;  %912 = vrot.lane.b32.xlu1 %v2229_v22, %s1885_s12 }
  0x7f   : > { %938 = vrot.lane.b32.xlu0 %v750_v42, %s1891_s19  ;;  %940 = vrot.lane.b32.xlu1 %v2260_v56, %s1891_s19 }
  0x83   : > { %958 = vrot.lane.b32.xlu0 %v2225_v21, %s1888_s23  ;;  %775 = vrot.lane.b32.xlu1 %v750_v42, %s1889_s15 }
  0x87   : > { %960 = vrot.lane.b32.xlu0 %v2240_v38, %s1888_s23  ;;  %777 = vrot.lane.b32.xlu1 %v2260_v56, %s1889_s15 }
  0x8b   : > { %832 = vrot.lane.b32.xlu0 %v2225_v21, %s1887_s17  ;;  %834 = vrot.lane.b32.xlu1 %v2240_v38, %s1887_s17 }
  0x8f   : > { %849 = vrot.lane.b32.xlu0 %v2229_v22, %s1884_s22  ;;  %851 = vrot.lane.b32.xlu1 %v2253_v46, %s1884_s22  ;;  %s1638_s22 = sshll.u32 %s1866_s24, 4  ;;  %s1641_s24 = sshll.u32 %s2554_s25, 1 }
  0x90   : > { %p371_p11 = scmp.lt.s32.totalorder %s1638_s22, 31 }
  0x92   : > { %s2562_s22 = smov (!%p371_p11, %s1638_s22), 31 }
  0x93   : > { %877 = vrot.lane.b32.xlu0 %v2260_v56, %s1890_s18  ;;  %879 = vrot.lane.b32.xlu1 %v2280_v16, %s1890_s18 }
  0x97   : > { %897 = vrot.lane.b32.xlu0 %v2240_v38, %s1886_s16  ;;  %899 = vrot.lane.b32.xlu1 %v2274_v7, %s1886_s16 }
  0x99   : > { %v840_v61 = vpop.permute.xlu1 %839  ;;  %v838_v21 = vpop.permute.xlu0 %837 }
  0x9b   : > { %914 = vrot.lane.b32.xlu0 %v2253_v46, %s1885_s12  ;;  %916 = vrot.lane.b32.xlu1 %v655_v23, %s1885_s12  ;;  %s374_s12 = sadd.s32 %s1633_s9, %s2562_s22  ;;  %s383_s9 = sadd.s32 %s1641_s24, %s2005_s21 }
  0x9c   : > { %s1640_s16 = sshll.u32 %s374_s12, 2  ;;  %s391_s8 = scalar_lea.vmem %s2540_s7, %s383_s9 }
  0x9d   : > { %v905_v43 = vpop.permute.xlu1 %904  ;;  %v903_v47 = vpop.permute.xlu0 %902  ;;  %s2444_s15 = scalar_lea.vmem %s2538_s5, %s1640_s16 }
  0x9f   : > { %942 = vrot.lane.b32.xlu0 %v2280_v16, %s1891_s19  ;;  %944 = vrot.lane.b32.xlu1 %v929_v35, %s1891_s19  ;;  %s384_s19 = scalar_lea.vmem %s2539_s6, %s383_s9 }
  0xa1   : > { %v886_v48 = vpop.permute.xlu0 %885  ;;  %v823_v50 = vpop.permute.xlu1 %822 }
  0xa3   : > { %962 = vrot.lane.b32.xlu0 %v2274_v7, %s1888_s23  ;;  %964 = vrot.lane.b32.xlu1 %v949_v29, %s1888_s23 }
  0xa5   : > { %v951_v38 = vpop.permute.xlu0 %950  ;;  %v888_v53 = vpop.permute.xlu1 %887 }
  0xa9   : > { %v953_v56 = vpop.permute.xlu0 %952  ;;  %v821_v46 = vpop.permute.xlu1 %820 }
  0xad   : > { %v766_v57 = vpop.permute.xlu0 %765  ;;  %v868_v62 = vpop.permute.xlu1 %867 }
  0xae   : > { %v970_v60 = vsel %vm966_vm6, %v2047_v59, %v766_v57 }
  0xaf   : > { %v987_v2 = vsel %vm983_vm7, %v970_v60, %v823_v50 }
  0xb0   : > { %v1004_v54 = vsel %vm1000_vm8, %v987_v2, %v840_v61 }
  0xb1   : > { %v866_v3 = vpop.permute.xlu0 %865  ;;  %v933_v52 = vpop.permute.xlu1 %932  ;;  %v1021_v5 = vsel %vm1017_vm9, %v1004_v54, %v868_v62 }
  0xb2   : > { %v1038_v8 = vsel %vm1034_vm10, %v1021_v5, %v888_v53 }
  0xb3   : > { %v1055_v13 = vsel %vm1051_vm11, %v1038_v8, %v905_v43 }
  0xb4   : > { %v1072_v16 = vsel %vm1068_vm12, %v1055_v13, %v933_v52 }
  0xb5   : > { %v931_v4 = vpop.permute.xlu0 %930  ;;  %v768_v7 = vpop.permute.xlu1 %767  ;;  %v1089_v0 = vsel %vm1085_vm13, %v1072_v16, %v953_v56 }
  0xb6   : > { %v972_v28 = vsel %vm966_vm6, %v2043_v58, %v768_v7 }
  0xb9   : > { %v764_v10 = vpop.permute.xlu0 %763  ;;  %v770_v11 = vpop.permute.xlu1 %769 }
  0xba   : > { %v968_v59 = vsel %vm966_vm6, %v2127_v55, %v764_v10  ;;  %v974_v35 = vsel %vm966_vm6, %v2057_v1, %v770_v11 }
  0xbb   : > { %v985_v12 = vsel %vm983_vm7, %v968_v59, %v821_v46 }
  0xbc   : > { %v1002_v14 = vsel %vm1000_vm8, %v985_v12, %v838_v21 }
  0xbd   : > { %v1019_v15 = vsel %vm1017_vm9, %v1002_v14, %v866_v3  ;;  %v825_v63 = vpop.permute.xlu0 %824  ;;  %v827_v17 = vpop.permute.xlu1 %826 }
  0xbe   : > { %v1036_v32 = vsel %vm1034_vm10, %v1019_v15, %v886_v48  ;;  %v989_v30 = vsel %vm983_vm7, %v972_v28, %v825_v63  ;;  %v991_v39 = vsel %vm983_vm7, %v974_v35, %v827_v17 }
  0xbf   : > { %v1053_v18 = vsel %vm1051_vm11, %v1036_v32, %v903_v47 }
  0xc0   : > { %v1070_v55 = vsel %vm1068_vm12, %v1053_v18, %v931_v4 }
  0xc1   : > { %v842_v19 = vpop.permute.xlu0 %841  ;;  %v1087_v20 = vsel %vm1085_vm13, %v1070_v55, %v951_v38  ;;  %v844_v23 = vpop.permute.xlu1 %843 }
  0xc2   : > { %1763 = vmatprep.mubr.msk.bf16.mxu0 %vm1138_vm14, %v1087_v20  ;;  %v1006_v31 = vsel %vm1000_vm8, %v989_v30, %v842_v19  ;;  %v1008_v58 = vsel %vm1000_vm8, %v991_v39, %v844_v23 }
  0xc3   : > { %1764 = vmatmul.mubr.msk.bf16.vlgmr.msra.gmra.mrb[0].mxu0 %vm1138_vm14, %v1089_v0 }
  0xc5   : > { %v870_v24 = vpop.permute.xlu0 %869  ;;  %v872_v25 = vpop.permute.xlu1 %871 }
  0xc6   : > { %v1023_v34 = vsel %vm1017_vm9, %v1006_v31, %v870_v24  ;;  %v1025_v9 = vsel %vm1017_vm9, %v1008_v58, %v872_v25 }
  0xc9   : > { %v890_v26 = vpop.permute.xlu0 %889  ;;  %v892_v27 = vpop.permute.xlu1 %891 }
  0xca   : > { %v1040_v36 = vsel %vm1034_vm10, %v1023_v34, %v890_v26  ;;  %v1042_v61 = vsel %vm1034_vm10, %v1025_v9, %v892_v27 }
  0xcd   : > { %v907_v51 = vpop.permute.xlu0 %906  ;;  %v909_v29 = vpop.permute.xlu1 %908 }
  0xce   : > { %v1057_v33 = vsel %vm1051_vm11, %v1040_v36, %v907_v51  ;;  %v1059_v1 = vsel %vm1051_vm11, %v1042_v61, %v909_v29 }
  0xd1   : > { %v935_v49 = vpop.permute.xlu0 %934  ;;  %v937_v37 = vpop.permute.xlu1 %936 }
  0xd2   : > { %v1074_v40 = vsel %vm1068_vm12, %v1057_v33, %v935_v49  ;;  %v1076_v43 = vsel %vm1068_vm12, %v1059_v1, %v937_v37 }
  0xd5   : > { %v955_v41 = vpop.permute.xlu0 %954  ;;  %v772_v21 = vpop.permute.xlu1 %771 }
  0xd6   : > { %v1091_v42 = vsel %vm1085_vm13, %v1074_v40, %v955_v41  ;;  %v976_v54 = vsel %vm966_vm6, %v2181_v45, %v772_v21 }
  0xd7   : > { %1767 = vmatprep.mubr.msk.bf16.mxu0 %vm1138_vm14, %v1091_v42 }
  0xd9   : > { %v957_v47 = vpop.permute.xlu0 %956  ;;  %v774_v50 = vpop.permute.xlu1 %773 }
  0xda   : > { %v1093_v48 = vsel %vm1085_vm13, %v1076_v43, %v957_v47  ;;  %v978_v10 = vsel %vm966_vm6, %v2249_v44, %v774_v50 }
  0xdb   : > { %1768 = vmatmul.mubr.msk.bf16.gmra.mrb[4].mxu0 %vm1138_vm14, %v1093_v48 }
  0xdd   : > { %v829_v38 = vpop.permute.xlu0 %828  ;;  %v831_v53 = vpop.permute.xlu1 %830 }
  0xde   : > { %v993_v4 = vsel %vm983_vm7, %v976_v54, %v829_v38  ;;  %v995_v12 = vsel %vm983_vm7, %v978_v10, %v831_v53 }
  0xe1   : > { %v846_v56 = vpop.permute.xlu0 %845  ;;  %v848_v46 = vpop.permute.xlu1 %847 }
  0xe2   : > { %v1010_v5 = vsel %vm1000_vm8, %v993_v4, %v846_v56  ;;  %v1012_v45 = vsel %vm1000_vm8, %v995_v12, %v848_v46 }
  0xe5   : > { %v874_v57 = vpop.permute.xlu0 %873  ;;  %v876_v60 = vpop.permute.xlu1 %875 }
  0xe6   : > { %v1027_v8 = vsel %vm1017_vm9, %v1010_v5, %v874_v57  ;;  %v1029_v63 = vsel %vm1017_vm9, %v1012_v45, %v876_v60 }
  0xe9   : > { %v894_v62 = vpop.permute.xlu0 %893  ;;  %v896_v2 = vpop.permute.xlu1 %895 }
  0xea   : > { %v1044_v59 = vsel %vm1034_vm10, %v1027_v8, %v894_v62  ;;  %v1046_v16 = vsel %vm1034_vm10, %v1029_v63, %v896_v2 }
  0xed   : > { %v911_v3 = vpop.permute.xlu0 %910  ;;  %v913_v52 = vpop.permute.xlu1 %912 }
  0xee   : > { %v1061_v13 = vsel %vm1051_vm11, %v1044_v59, %v911_v3  ;;  %v1063_v44 = vsel %vm1051_vm11, %v1046_v16, %v913_v52 }
  0xf1   : > { %v939_v7 = vpop.permute.xlu0 %938  ;;  %v941_v11 = vpop.permute.xlu1 %940 }
  0xf2   : > { %v1078_v14 = vsel %vm1068_vm12, %v1061_v13, %v939_v7  ;;  %v1080_v18 = vsel %vm1068_vm12, %v1063_v44, %v941_v11 }
  0xf5   : > { %v959_v15 = vpop.permute.xlu0 %958  ;;  %v776_v17 = vpop.permute.xlu1 %775 }
  0xf6   : > { %v1095_v32 = vsel %vm1085_vm13, %v1078_v14, %v959_v15  ;;  %v980_v30 = vsel %vm966_vm6, %v2211_v6, %v776_v17 }
  0xf7   : > { %1771 = vmatprep.mubr.msk.bf16.mxu1 %vm1138_vm14, %v1095_v32 }
  0xf9   : > { %v961_v55 = vpop.permute.xlu0 %960  ;;  %v778_v20 = vpop.permute.xlu1 %777 }
  0xfa   : > { %v1097_v19 = vsel %vm1085_vm13, %v1080_v18, %v961_v55  ;;  %v982_v34 = vsel %vm966_vm6, %v2229_v22, %v778_v20 }
  0xfb   : > { %1772 = vmatmul.mubr.msk.bf16.vlgmr.msra.gmra.mrb[0].mxu1 %vm1138_vm14, %v1097_v19 }
  0xfd   : > { %v833_v0 = vpop.permute.xlu0 %832  ;;  %v835_v23 = vpop.permute.xlu1 %834 }
  0xfe   : > { %v997_v49 = vsel %vm983_vm7, %v980_v30, %v833_v0  ;;  %v999_v37 = vsel %vm983_vm7, %v982_v34, %v835_v23 }
 0x101   : > { %v850_v24 = vpop.permute.xlu0 %849  ;;  %v852_v25 = vpop.permute.xlu1 %851 }
 0x102   : > { %v1014_v35 = vsel %vm1000_vm8, %v997_v49, %v850_v24  ;;  %v1016_v33 = vsel %vm1000_vm8, %v999_v37, %v852_v25 }
 0x105   : > { %v878_v26 = vpop.permute.xlu0 %877  ;;  %v880_v27 = vpop.permute.xlu1 %879 }
 0x106   : > { %v1031_v39 = vsel %vm1017_vm9, %v1014_v35, %v878_v26  ;;  %v1033_v6 = vsel %vm1017_vm9, %v1016_v33, %v880_v27 }
 0x109   : > { %v898_v51 = vpop.permute.xlu0 %897  ;;  %v900_v28 = vpop.permute.xlu1 %899 }
 0x10a   : > { %v1048_v58 = vsel %vm1034_vm10, %v1031_v39, %v898_v51  ;;  %v1050_v22 = vsel %vm1034_vm10, %v1033_v6, %v900_v28 }
 0x10d   : > { %v915_v29 = vpop.permute.xlu0 %914  ;;  %v917_v31 = vpop.permute.xlu1 %916 }
 0x10e   : > { %v1065_v41 = vsel %vm1051_vm11, %v1048_v58, %v915_v29  ;;  %v1067_v61 = vsel %vm1051_vm11, %v1050_v22, %v917_v31 }
 0x111   : > { %v943_v36 = vpop.permute.xlu0 %942  ;;  %v945_v40 = vpop.permute.xlu1 %944 }
 0x112   : > { %v1082_v9 = vsel %vm1068_vm12, %v1065_v41, %v943_v36  ;;  %v1084_v1 = vsel %vm1068_vm12, %v1067_v61, %v945_v40 }
 0x115   : > { %v963_v42 = vpop.permute.xlu0 %962  ;;  %v965_v43 = vpop.permute.xlu1 %964 }
 0x116   : > { %v1099_v21 = vsel %vm1085_vm13, %v1082_v9, %v963_v42  ;;  %v1101_v47 = vsel %vm1085_vm13, %v1084_v1, %v965_v43 }
 0x117   : > { %1775 = vmatprep.mubr.msk.bf16.mxu1 %vm1138_vm14, %v1099_v21 }
 0x118   : > { %1776 = vmatmul.mubr.msk.bf16.gmra.mrb[4].mxu1 %vm1138_vm14, %v1101_v47 }
 0x196   : > { %v1765_v48 = vpop.f32.mrb[0].mxu0 }
 0x197   : > { %v1678_v50 = vpack.c.bf16 %v1765_v48, %v1765_v48  ;;  %v1193_v38 = vpop.f32.mrb[1].mxu0  ;;  %v1378_v57 = vmul.f32 %v1765_v48, %v1765_v48  ;;  %v1340_v5 = vsel %vm966_vm6, %v1765_v48, 0.0 }
 0x198   : > { %v1676_v53 = vpack.c.bf16 %v1193_v38, %v1193_v38  ;;  %v1376_v56 = vmul.f32 %v1193_v38, %v1193_v38  ;;  %v1766_v46 = vpop.f32.mrb[2].mxu0  ;;  %v1337_v2 = vsel %vm966_vm6, %v1193_v38, 0.0 }
 0x199   : > { %1323 = vst.msk [vmem:[%s2444_s15 + $0x8] sm:$0xf] %vm1320_vm15, %v1678_v50  ;;  %v1679_v60 = vpack.c.bf16 %v1766_v46, %v1766_v46  ;;  %v1196_v62 = vpop.f32.mrb[3].mxu0  ;;  %v1379_v8 = vmul.f32 %v1766_v46, %v1766_v46  ;;  %v1395_v12 = vsel %vm966_vm6, %v1378_v57, 0.0  ;;  %v1342_v13 = vsel %vm966_vm6, %v1766_v46, 0.0 }
 0x19a   : > { %1321 = vst.msk [vmem:[%s2444_s15] sm:$0xf] %vm1320_vm15, %v1676_v53  ;;  %v1677_v3 = vpack.c.bf16 %v1196_v62, %v1196_v62  ;;  %v1338_v54 = vsel %vm966_vm6, %v1196_v62, 0.0  ;;  %v1377_v52 = vmul.f32 %v1196_v62, %v1196_v62  ;;  %v1392_v7 = vsel %vm966_vm6, %v1376_v56, 0.0 }
 0x19b   : > { %1324 = vst.msk [vmem:[%s2444_s15 + $0xc] sm:$0xf] %vm1320_vm15, %v1679_v60  ;;  %v1339_v4 = vadd.f32 %v1338_v54, %v1337_v2  ;;  %v1397_v15 = vsel %vm966_vm6, %v1379_v8, 0.0 }
 0x19c   : > { %1322 = vst.msk [vmem:[%s2444_s15 + $0x4] sm:$0xf] %vm1320_vm15, %v1677_v3  ;;  %v1393_v10 = vsel %vm966_vm6, %v1377_v52, 0.0 }
 0x19d   : > { %v1341_v59 = vadd.f32 %v1340_v5, %v1339_v4  ;;  %v1394_v11 = vadd.f32 %v1393_v10, %v1392_v7 }
 0x19f   : > { %v1396_v45 = vadd.f32 %v1395_v12, %v1394_v11  ;;  %v1343_v14 = vadd.f32 %v1342_v13, %v1341_v59 }
 0x1a1   : > { %v1398_v63 = vadd.f32 %v1397_v15, %v1396_v45 }
 0x1ae   : > { %v1769_v32 = vpop.f32.mrb[4].mxu0 }
 0x1af   : > { %v1682_v16 = vpack.c.bf16 %v1769_v32, %v1769_v32  ;;  %v1209_v17 = vpop.f32.mrb[5].mxu0  ;;  %v1382_v27 = vmul.f32 %v1769_v32, %v1769_v32  ;;  %v1348_v30 = vsel %vm966_vm6, %v1769_v32, 0.0 }
 0x1b0   : > { %v1680_v44 = vpack.c.bf16 %v1209_v17, %v1209_v17  ;;  %v1344_v18 = vsel %vm966_vm6, %v1209_v17, 0.0  ;;  %v1380_v55 = vmul.f32 %v1209_v17, %v1209_v17  ;;  %v1770_v19 = vpop.f32.mrb[6].mxu0 }
 0x1b1   : > { %1327 = vst.msk [vmem:[%s2444_s15 + $0x18] sm:$0xf] %vm1320_vm15, %v1682_v16  ;;  %v1345_v20 = vadd.f32 %v1344_v18, %v1343_v14  ;;  %v1683_v0 = vpack.c.bf16 %v1770_v19, %v1770_v19  ;;  %v1212_v23 = vpop.f32.mrb[7].mxu0  ;;  %v1383_v31 = vmul.f32 %v1770_v19, %v1770_v19  ;;  %v1350_v35 = vsel %vm966_vm6, %v1770_v19, 0.0 }
 0x1b2   : > { %1325 = vst.msk [vmem:[%s2444_s15 + $0x10] sm:$0xf] %vm1320_vm15, %v1680_v44  ;;  %v1399_v24 = vsel %vm966_vm6, %v1380_v55, 0.0  ;;  %v1681_v25 = vpack.c.bf16 %v1212_v23, %v1212_v23  ;;  %v1346_v26 = vsel %vm966_vm6, %v1212_v23, 0.0  ;;  %v1381_v29 = vmul.f32 %v1212_v23, %v1212_v23 }
 0x1b3   : > { %v1400_v51 = vadd.f32 %v1399_v24, %v1398_v63  ;;  %1328 = vst.msk [vmem:[%s2444_s15 + $0x1c] sm:$0xf] %vm1320_vm15, %v1683_v0  ;;  %v1347_v28 = vadd.f32 %v1346_v26, %v1345_v20  ;;  %v1403_v37 = vsel %vm966_vm6, %v1382_v27, 0.0  ;;  %v1405_v58 = vsel %vm966_vm6, %v1383_v31, 0.0 }
 0x1b4   : > { %1326 = vst.msk [vmem:[%s2444_s15 + $0x14] sm:$0xf] %vm1320_vm15, %v1681_v25  ;;  %v1401_v34 = vsel %vm966_vm6, %v1381_v29, 0.0 }
 0x1b5   : > { %v1349_v49 = vadd.f32 %v1348_v30, %v1347_v28  ;;  %v1402_v36 = vadd.f32 %v1401_v34, %v1400_v51 }
 0x1b7   : > { %v1351_v39 = vadd.f32 %v1350_v35, %v1349_v49  ;;  %v1404_v33 = vadd.f32 %v1403_v37, %v1402_v36 }
 0x1b9   : > { %v1406_v40 = vadd.f32 %v1405_v58, %v1404_v33 }
 0x1ce   : > { %v1773_v6 = vpop.f32.mrb[0].mxu1 }
 0x1cf   : > { %v1686_v41 = vpack.c.bf16 %v1773_v6, %v1773_v6  ;;  %v1225_v22 = vpop.f32.mrb[1].mxu1  ;;  %v1386_v53 = vmul.f32 %v1773_v6, %v1773_v6  ;;  %v1356_v60 = vsel %vm966_vm6, %v1773_v6, 0.0 }
 0x1d0   : > { %v1684_v9 = vpack.c.bf16 %v1225_v22, %v1225_v22  ;;  %v1352_v42 = vsel %vm966_vm6, %v1225_v22, 0.0  ;;  %v1384_v61 = vmul.f32 %v1225_v22, %v1225_v22  ;;  %v1774_v21 = vpop.f32.mrb[2].mxu1 }
 0x1d1   : > { %1331 = vst.msk [vmem:[%s2444_s15 + $0x28] sm:$0xf] %vm1320_vm15, %v1686_v41  ;;  %v1353_v1 = vadd.f32 %v1352_v42, %v1351_v39  ;;  %v1687_v43 = vpack.c.bf16 %v1774_v21, %v1774_v21  ;;  %v1228_v47 = vpop.f32.mrb[3].mxu1  ;;  %v1387_v62 = vmul.f32 %v1774_v21, %v1774_v21  ;;  %v1358_v54 = vsel %vm966_vm6, %v1774_v21, 0.0 }
 0x1d2   : > { %1329 = vst.msk [vmem:[%s2444_s15 + $0x20] sm:$0xf] %vm1320_vm15, %v1684_v9  ;;  %v1407_v48 = vsel %vm966_vm6, %v1384_v61, 0.0  ;;  %v1685_v50 = vpack.c.bf16 %v1228_v47, %v1228_v47  ;;  %v1354_v38 = vsel %vm966_vm6, %v1228_v47, 0.0  ;;  %v1385_v57 = vmul.f32 %v1228_v47, %v1228_v47 }
 0x1d3   : > { %v1408_v56 = vadd.f32 %v1407_v48, %v1406_v40  ;;  %1332 = vst.msk [vmem:[%s2444_s15 + $0x2c] sm:$0xf] %vm1320_vm15, %v1687_v43  ;;  %v1355_v46 = vadd.f32 %v1354_v38, %v1353_v1  ;;  %v1411_v4 = vsel %vm966_vm6, %v1386_v53, 0.0  ;;  %v1413_v8 = vsel %vm966_vm6, %v1387_v62, 0.0 }
 0x1d4   : > { %1330 = vst.msk [vmem:[%s2444_s15 + $0x24] sm:$0xf] %vm1320_vm15, %v1685_v50  ;;  %v1409_v3 = vsel %vm966_vm6, %v1385_v57, 0.0 }
 0x1d5   : > { %v1357_v2 = vadd.f32 %v1356_v60, %v1355_v46  ;;  %v1410_v52 = vadd.f32 %v1409_v3, %v1408_v56 }
 0x1d7   : > { %v1359_v5 = vadd.f32 %v1358_v54, %v1357_v2  ;;  %v1412_v7 = vadd.f32 %v1411_v4, %v1410_v52 }
 0x1d9   : > { %v1414_v10 = vadd.f32 %v1413_v8, %v1412_v7 }
 0x1eb   : > { %v1777_v59 = vpop.f32.mrb[4].mxu1 }
 0x1ec   : > { %v1690_v11 = vpack.c.bf16 %v1777_v59, %v1777_v59  ;;  %v1241_v12 = vpop.f32.mrb[5].mxu1  ;;  %v1390_v55 = vmul.f32 %v1777_v59, %v1777_v59  ;;  %v1364_v23 = vsel %vm966_vm6, %v1777_v59, 0.0 }
 0x1ed   : > { %v1688_v13 = vpack.c.bf16 %v1241_v12, %v1241_v12  ;;  %v1360_v45 = vsel %vm966_vm6, %v1241_v12, 0.0  ;;  %v1388_v14 = vmul.f32 %v1241_v12, %v1241_v12  ;;  %v1778_v15 = vpop.f32.mrb[6].mxu1 }
 0x1ee   : > { %1335 = vst.msk [vmem:[%s2444_s15 + $0x38] sm:$0xf] %vm1320_vm15, %v1690_v11  ;;  %v1361_v63 = vadd.f32 %v1360_v45, %v1359_v5  ;;  %v1691_v32 = vpack.c.bf16 %v1778_v15, %v1778_v15  ;;  %v1244_v16 = vpop.f32.mrb[7].mxu1  ;;  %v1391_v24 = vmul.f32 %v1778_v15, %v1778_v15  ;;  %v1366_v27 = vsel %vm966_vm6, %v1778_v15, 0.0 }
 0x1ef   : > { %1333 = vst.msk [vmem:[%s2444_s15 + $0x30] sm:$0xf] %vm1320_vm15, %v1688_v13  ;;  %v1415_v17 = vsel %vm966_vm6, %v1388_v14, 0.0  ;;  %v1689_v44 = vpack.c.bf16 %v1244_v16, %v1244_v16  ;;  %v1362_v18 = vsel %vm966_vm6, %v1244_v16, 0.0  ;;  %v1389_v0 = vmul.f32 %v1244_v16, %v1244_v16 }
 0x1f0   : > { %v1416_v19 = vadd.f32 %v1415_v17, %v1414_v10  ;;  %1336 = vst.msk [vmem:[%s2444_s15 + $0x3c] sm:$0xf] %vm1320_vm15, %v1691_v32  ;;  %v1363_v20 = vadd.f32 %v1362_v18, %v1361_v63  ;;  %v1419_v28 = vsel %vm966_vm6, %v1390_v55, 0.0  ;;  %v1421_v31 = vsel %vm966_vm6, %v1391_v24, 0.0 }
 0x1f1   : > { %1334 = vst.msk [vmem:[%s2444_s15 + $0x34] sm:$0xf] %vm1320_vm15, %v1689_v44  ;;  %v1417_v26 = vsel %vm966_vm6, %v1389_v0, 0.0 }
 0x1f2   : > { %v1365_v25 = vadd.f32 %v1364_v23, %v1363_v20  ;;  %v1418_v51 = vadd.f32 %v1417_v26, %v1416_v19 }
 0x1f4   : > { %v1367_v29 = vadd.f32 %v1366_v27, %v1365_v25  ;;  %v1420_v30 = vadd.f32 %v1419_v28, %v1418_v51 }
 0x1f6   : > { %v1368_v49 = vrot.slane %v1367_v29, 4  ;;  %v1422_v34 = vadd.f32 %v1421_v31, %v1420_v30 }
 0x1f8   : > { %v1369_v35 = vadd.f32 %v1368_v49, %v1367_v29  ;;  %v1423_v36 = vrot.slane %v1422_v34, 4 }
 0x1fa   : > { %v1370_v37 = vrot.slane %v1369_v35, 2  ;;  %v1424_v39 = vadd.f32 %v1423_v36, %v1422_v34 }
 0x1fc   : > { %v1371_v33 = vadd.f32 %v1370_v37, %v1369_v35  ;;  %v1425_v58 = vrot.slane %v1424_v39, 2 }
 0x1fe   : > { %v1372_v40 = vrot.slane %v1371_v33, 1  ;;  %v1426_v6 = vadd.f32 %v1425_v58, %v1424_v39 }
 0x200   : > { %v1373_v41 = vadd.f32 %v1372_v40, %v1371_v33  ;;  %v1427_v22 = vrot.slane %v1426_v6, 1 }
 0x202   : > { %1375 = vst.msk [vmem:[%s384_s19] sm:$0x1] %vm1374_vm0, %v1373_v41  ;;  %v1428_v9 = vadd.f32 %v1427_v22, %v1426_v6 }
 0x204   : > { %1429 = vst.msk [vmem:[%s391_s8] sm:$0x1] %vm1374_vm0, %v1428_v9 }
 0x205 PF: > { %s18_s28 = sadd.s32 1, %s1882_s28   ;;  %s2543_s24 = smov %s1874_s26 }
 0x206   : > { %p15_p12 = scmp.ge.s32.totalorder %s18_s28, 6   ;;  %s2544_s25 = smov %s1878_s27 }
 0x207   : > { %s2545_s26 = smov %s2548_s29  ;;  %s2546_s27 = smov %s2552_s30 }
 0x208   :  { %17 = sbr.rel (!%p15_p12) target bundleno = 3 (0x3), region = 97 }

</bundles_post_ra>
